<compile_context>
chip_gen: v7x
topology: tpu7x:2x2x1
jax: 0.10.0
libtpu: 0.0.40
codegen_flags: <defaults>
</compile_context>

<pallas_src>
import jax
import jax.numpy as jnp
from jax.experimental import pallas as pl
from jax.experimental.pallas import tpu as pltpu


def _round_up(x, m):
    return ((x + m - 1) // m) * m


# ---------------------------------------------------------------------------
# decompose_param (SVD) — plain JAX glue, runs inside the same jit as the
# Pallas call.
# TODO(synk): torch.svd / jnp.linalg.svd has no clean Pallas equivalent and
# dominates end-to-end wall clock (iterative Jacobi on TPU).  An eigh of the
# small Gram matrix M^T M would be cheaper, but changes the implementation-
# defined singular-vector sign convention, so the SVD path is kept as-is.
# ---------------------------------------------------------------------------
def decompose_param(w, r):
    c0, c1, k, _ = w.shape
    r_eff = min(r, c0 * k, c1 * k)
    m = w.reshape(c0 * k, c1 * k).astype(jnp.float32)
    # torch.svd: M = U diag(S) V^T ; jnp.linalg.svd returns U, S, Vh (= V^T).
    U, S, Vh = jnp.linalg.svd(m, full_matrices=False)
    s_sqrt = jnp.sqrt(S[:r_eff])
    loraA = (U[:, :r_eff] * s_sqrt[None, :]).T    # (r_eff, c0*k)
    loraB = s_sqrt[:, None] * Vh[:r_eff, :]       # (r_eff, c1*k)
    return loraA, loraB


# ---------------------------------------------------------------------------
# Pallas kernel.
#   lhs_ref : (S*RP, DP)          f32  - S stacked samples of [loraA|loraB|1]
#   w_ref   : (DP, OA_PAD+OB_PAD) bf16 - block-diag [[WA,0],[0,WB],[bA,bB]]
#   out_ref : (S*OUTB_STORE, OA_PAD) f32
# One bf16 MXU matmul fuses both mapper Linears + both bias adds for all S
# samples at once (M = S*RP rows fills the systolic array), then one small
# bf16 contraction per sample produces b_mapped^T @ a_mapped.
#
# INVARIANT: lhs rows r_eff..RP of every sample (and every batch-padding
# sample) must be ALL-zero *including the ones column*; otherwise the second
# contraction picks up spurious (RP - r_eff) * bB^T @ bA terms.
# ---------------------------------------------------------------------------
def _make_hyper_kernel(samples_per_block, rp, outa_pad, outb_store):
    def kernel(lhs_ref, w_ref, out_ref):
        lhs = lhs_ref[...].astype(jnp.bfloat16)                 # (S*RP, DP)
        mapped = jnp.dot(lhs, w_ref[...],
                         preferred_element_type=jnp.float32)    # (S*RP, OA+OB) f32
        for s in range(samples_per_block):                      # static unroll
            r0 = s * rp
            # 128-aligned split: a-columns / b-columns (no cross-lane copies).
            a_s = mapped[r0:r0 + rp, :outa_pad].astype(jnp.bfloat16)   # (RP, OA)
            b_s = mapped[r0:r0 + rp, outa_pad:].astype(jnp.bfloat16)   # (RP, OB)
            # b_mapped^T @ a_mapped : contract over the r axis (axis 0 of both).
            res = jax.lax.dot_general(
                b_s, a_s,
                dimension_numbers=(((0,), (0,)), ((), ())),
                preferred_element_type=jnp.float32)                     # (OB, OA)
            out_ref[s * outb_store:(s + 1) * outb_store, :] = res[:outb_store, :]
    return kernel


class LRFConvHyperNetwork:
    """JAX/Pallas re-implementation of the PyTorch LRFConvHyperNetwork
    (hidden_size=None path: a single Linear per mapper)."""

    MAX_SAMPLES_PER_BLOCK = 16   # 16 samples * RP=8 rows = 128 MXU rows / pass

    def __init__(self, conv1_weight_shape, conv2_weight_shape, r=8, key=None):
        self.r = r
        self.conv1_weight_shape = tuple(conv1_weight_shape)
        self.target_shape = tuple(conv2_weight_shape)           # (out, in, k, k)

        c0_1, c1_1, k1, _ = conv1_weight_shape
        out2, in2, k2, _ = conv2_weight_shape

        self.dA = dA = c0_1 * k1               # loraA_conv1.shape[1]
        self.dB = dB = c1_1 * k1               # loraB_conv1.shape[1]
        self.outA = outA = in2 * k2            # target_in_channels * target_kernel_size
        self.outB = outB = out2 * k2           # target_out_channels * target_kernel_size
        self.r_eff = min(r, dA, dB)

        # Padded geometry: lane-aligned 128-column blocks, sublane-aligned rows.
        self.RP = _round_up(max(self.r_eff, 1), 8)              # sublane pad of r
        self.DP = _round_up(dA + dB + 1, 128)                   # +1 = bias "ones" column
        self.OUTA_PAD = _round_up(outA, 128)                    # lane-dense output
        self.OUTB_PAD = _round_up(outB, 128)
        self.OUTB_STORE = _round_up(outB, 8)                    # trimmed sublane writeback

        if key is None:
            key = jax.random.PRNGKey(0)
        kwa, kba, kwb, kbb = jax.random.split(key, 4)

        # Deterministic PyTorch-Linear-style init: U(-1/sqrt(fan_in), 1/sqrt(fan_in)).
        boundA = 1.0 / float(dA) ** 0.5
        boundB = 1.0 / float(dB) ** 0.5
        # Stored (in_features, out_features) so the kernel computes x @ W.
        self.WA = jax.random.uniform(kwa, (dA, outA), jnp.float32, -boundA, boundA)
        self.bA = jax.random.uniform(kba, (outA,), jnp.float32, -boundA, boundA)
        self.WB = jax.random.uniform(kwb, (dB, outB), jnp.float32, -boundB, boundB)
        self.bB = jax.random.uniform(kbb, (outB,), jnp.float32, -boundB, boundB)

        # Pre-packed block-diagonal weight slab (single DMA instead of four),
        # stored in bf16 (MXU-native; halves the weight DMA):
        #   rows [0:dA)      : WA -> columns [0:outA)
        #   rows [dA:dA+dB)  : WB -> columns [OUTA_PAD : OUTA_PAD+outB)
        #   row  dA+dB       : biases (ride the matmul via the ones column)
        w = jnp.zeros((self.DP, self.OUTA_PAD + self.OUTB_PAD), jnp.float32)
        w = w.at[:dA, :outA].set(self.WA)
        w = w.at[dA:dA + dB, self.OUTA_PAD:self.OUTA_PAD + outB].set(self.WB)
        w = w.at[dA + dB, :outA].set(self.bA)
        w = w.at[dA + dB, self.OUTA_PAD:self.OUTA_PAD + outB].set(self.bB)
        self.W_packed = w.astype(jnp.bfloat16)

        self._pallas_cache = {}
        # One jit over each whole forward: SVD + packing + Pallas custom call.
        self._forward = jax.jit(self._forward_impl)
        self._forward_batched = jax.jit(self._forward_batched_impl)

    # -- pallas_call builder --------------------------------------------------
    def _get_pallas(self, num_blocks, samples_per_block):
        key = (num_blocks, samples_per_block)
        if key in self._pallas_cache:
            return self._pallas_cache[key]

        S = samples_per_block
        n_samples = num_blocks * S
        wcols = self.OUTA_PAD + self.OUTB_PAD
        flops = n_samples * (2 * self.RP * self.DP * wcols
                             + 2 * self.RP * self.OUTB_PAD * self.OUTA_PAD)
        bytes_accessed = (n_samples * self.RP * self.DP * 4                    # lhs (f32)
                          + self.DP * wcols * 2                                # W   (bf16)
                          + n_samples * self.OUTB_STORE * self.OUTA_PAD * 4)   # out (f32)

        fn = pl.pallas_call(
            _make_hyper_kernel(S, self.RP, self.OUTA_PAD, self.OUTB_STORE),
            out_shape=jax.ShapeDtypeStruct(
                (n_samples * self.OUTB_STORE, self.OUTA_PAD), jnp.float32),
            grid_spec=pltpu.PrefetchScalarGridSpec(
                num_scalar_prefetch=0,
                grid=(num_blocks,),
                in_specs=[
                    # per-step lhs block: S stacked samples (double-buffered)
                    pl.BlockSpec((S * self.RP, self.DP), lambda i: (i, 0)),
                    # weight slab: same block every step -> stays VMEM-resident
                    pl.BlockSpec((self.DP, wcols), lambda i: (0, 0)),
                ],
                out_specs=pl.BlockSpec(
                    (S * self.OUTB_STORE, self.OUTA_PAD), lambda i: (i, 0)),
            ),
            compiler_params=pltpu.CompilerParams(
                dimension_semantics=("parallel",)),     # v7x: split batch over 2 TCs
            cost_estimate=pl.CostEstimate(
                flops=int(flops), transcendentals=0,
                bytes_accessed=int(bytes_accessed)),
        )
        self._pallas_cache[key] = fn
        return fn

    # -- lhs packing -----------------------------------------------------------
    def _pack_lhs(self, loraA, loraB):
        """loraA: (B, r_eff, dA), loraB: (B, r_eff, dB) -> (B, RP, DP) f32.
        Rows r_eff..RP stay ALL-zero (including the ones column): required so
        padded rows contribute nothing to b_mapped^T @ a_mapped."""
        B = loraA.shape[0]
        ones = jnp.ones((B, self.r_eff, 1), jnp.float32)
        core = jnp.concatenate(
            [loraA.astype(jnp.float32), loraB.astype(jnp.float32), ones], axis=-1)
        lhs = jnp.zeros((B, self.RP, self.DP), jnp.float32)
        return lhs.at[:, :self.r_eff, :core.shape[-1]].set(core)

    # -- forward: single sample (matches the torch module's forward(x)) -------
    def _forward_impl(self, x):
        if x.ndim == 5:                          # matches `x = x.squeeze(0)`
            x = x[0]
        # Geometry (RP/DP/OUT*_PAD) was frozen at __init__ from conv1's shape.
        assert tuple(x.shape) == self.conv1_weight_shape, (
            f"x shape {tuple(x.shape)} != conv1 weight shape {self.conv1_weight_shape}")
        loraA, loraB = decompose_param(x, self.r)          # (r_eff, dA), (r_eff, dB)
        lhs = self._pack_lhs(loraA[None], loraB[None])[0]  # (RP, DP)
        out = self._get_pallas(1, 1)(lhs, self.W_packed)   # (OUTB_STORE, OUTA_PAD)
        return out[:self.outB, :self.outA].reshape(self.target_shape)

    # -- forward: batched (amortizes launch, fills the MXU, keeps W resident) --
    def _forward_batched_impl(self, xs):
        assert xs.ndim == 5 and tuple(xs.shape[1:]) == self.conv1_weight_shape, xs.shape
        B = xs.shape[0]
        loraA, loraB = jax.vmap(lambda w: decompose_param(w, self.r))(xs)
        lhs = self._pack_lhs(loraA, loraB)                          # (B, RP, DP)

        S = max(1, min(self.MAX_SAMPLES_PER_BLOCK, B))
        num_blocks = -(-B // S)
        B_pad = num_blocks * S
        # Batch-padding samples are all-zero (incl. ones column) -> output 0.
        lhs = jnp.pad(lhs, ((0, B_pad - B), (0, 0), (0, 0)))
        lhs = lhs.reshape(B_pad * self.RP, self.DP)

        out = self._get_pallas(num_blocks, S)(lhs, self.W_packed)
        out = out.reshape(B_pad, self.OUTB_STORE, self.OUTA_PAD)
        out = out[:B, :self.outB, :self.outA]
        return out.reshape((B,) + self.target_shape)

    def __call__(self, x):
        return self._forward(x)

    def forward_batched(self, xs):
        return self._forward_batched(xs)

    # -- references ------------------------------------------------------------
    def reference(self, x):
        """Pure-JAX f32 HIGHEST-precision reference (torch-module semantics)."""
        if x.ndim == 5:
            x = x[0]
        la, lb = decompose_param(x, self.r)
        hi = jax.lax.Precision.HIGHEST
        a_mapped = jnp.dot(la, self.WA, precision=hi) + self.bA
        b_mapped = jnp.dot(lb, self.WB, precision=hi) + self.bB
        return jnp.dot(b_mapped.T, a_mapped, precision=hi).reshape(self.target_shape)

    def reference_bf16(self, x):
        """Numerics-matched reference: same bf16-operand / f32-accumulate
        arithmetic as the Pallas kernel (tight structural check)."""
        if x.ndim == 5:
            x = x[0]
        la, lb = decompose_param(x, self.r)
        la = la.astype(jnp.bfloat16)
        lb = lb.astype(jnp.bfloat16)
        WA = self.WA.astype(jnp.bfloat16)
        WB = self.WB.astype(jnp.bfloat16)
        bA = self.bA.astype(jnp.bfloat16).astype(jnp.float32)
        bB = self.bB.astype(jnp.bfloat16).astype(jnp.float32)
        a_mapped = (jnp.dot(la, WA, preferred_element_type=jnp.float32) + bA
                    ).astype(jnp.bfloat16)
        b_mapped = (jnp.dot(lb, WB, preferred_element_type=jnp.float32) + bB
                    ).astype(jnp.bfloat16)
        out = jax.lax.dot_general(
            b_mapped, a_mapped,
            dimension_numbers=(((0,), (0,)), ((), ())),
            preferred_element_type=jnp.float32)
        return out.reshape(self.target_shape)


if __name__ == "__main__":
    key = jax.random.PRNGKey(0)
    k_x, k_xs, k_params = jax.random.split(key, 3)

    # conv1.weight: (out=8, in=4, k=3, k=3); conv2.weight: (out=8, in=6, k=3, k=3)
    conv1_shape = (8, 4, 3, 3)
    conv2_shape = (8, 6, 3, 3)
    r = 8

    net = LRFConvHyperNetwork(conv1_shape, conv2_shape, r=r, key=k_params)

    # --- single-sample forward (matches the PyTorch forward(x)) ---------------
    x = jax.random.normal(k_x, (1,) + conv1_shape, dtype=jnp.float32)
    out = jax.block_until_ready(net(x))
    assert out.shape == conv2_shape, out.shape

    ref_match = jax.block_until_ready(net.reference_bf16(x))   # kernel-matched numerics
    ref_f32 = jax.block_until_ready(net.reference(x))          # exact f32 math
    assert jnp.allclose(out, ref_match, atol=1e-2, rtol=1e-2), "mismatch vs bf16-matched ref"
    assert jnp.allclose(out, ref_f32, atol=6e-2, rtol=6e-2), "mismatch vs f32 reference"

    # --- batched forward: amortizes launch overhead, keeps W VMEM-resident ----
    B = 20
    xs = jax.random.normal(k_xs, (B,) + conv1_shape, dtype=jnp.float32)
    out_b = jax.block_until_ready(net.forward_batched(xs))
    assert out_b.shape == (B,) + conv2_shape, out_b.shape
    ref_b = jax.block_until_ready(jax.jit(jax.vmap(net.reference_bf16))(xs))
    assert jnp.allclose(out_b, ref_b, atol=1e-2, rtol=1e-2), "batched mismatch"

    print("KERNEL_OK")
</pallas_src>

<mosaic_0001>
module attributes {stable_mosaic.version = 11 : i64} {
  func.func @kernel(%arg0: i32, %arg1: memref<8x128xf32, #tpu.memory_space<vmem>>, %arg2: memref<128x256xbf16, #tpu.memory_space<vmem>>, %arg3: memref<24x128xf32, #tpu.memory_space<vmem>>) attributes {dimension_semantics = [#tpu.dimension_semantics<parallel>], iteration_bounds = array<i64: 1>, scalar_prefetch = 0 : i64, scratch_operands = 0 : i64, tpu.core_type = #tpu.core_type<tc>, window_params = [{transform_indices = @transform_0, window_bounds = array<i64: 8, 128>}, {pipeline_mode = #tpu.pipeline_mode<synchronous>, transform_indices = @transform_1, window_bounds = array<i64: 128, 256>}, {transform_indices = @transform_2, window_bounds = array<i64: 24, 128>}]} {
    %c0 = arith.constant 0 : index
    %c0_0 = arith.constant 0 : index
    %0 = vector.load %arg1[%c0, %c0_0] : memref<8x128xf32, #tpu.memory_space<vmem>>, vector<8x128xf32>
    %1 = arith.truncf %0 : vector<8x128xf32> to vector<8x128xbf16>
    %c0_1 = arith.constant 0 : index
    %c0_2 = arith.constant 0 : index
    %2 = vector.load %arg2[%c0_1, %c0_2] : memref<128x256xbf16, #tpu.memory_space<vmem>>, vector<128x256xbf16>
    %cst = arith.constant dense<0.000000e+00> : vector<8x256xf32>
    %3 = tpu.matmul %1, %2, %cst {dimension_numbers = #tpu.dot_dimension_numbers<[1], [0], [0], [1], [0, 0, 1, 1], [], []>} : vector<8x128xbf16>, vector<128x256xbf16>, vector<8x256xf32> -> vector<8x256xf32>
    %4 = vector.extract_strided_slice %3 {offsets = [0, 0], sizes = [8, 128], strides = [1, 1]} : vector<8x256xf32> to vector<8x128xf32>
    %5 = arith.truncf %4 : vector<8x128xf32> to vector<8x128xbf16>
    %6 = vector.extract_strided_slice %3 {offsets = [0, 128], sizes = [8, 128], strides = [1, 1]} : vector<8x256xf32> to vector<8x128xf32>
    %7 = arith.truncf %6 : vector<8x128xf32> to vector<8x128xbf16>
    %cst_3 = arith.constant dense<0.000000e+00> : vector<128x128xf32>
    %8 = tpu.matmul %7, %5, %cst_3 {dimension_numbers = #tpu.dot_dimension_numbers<[0], [0], [1], [1], [0, 1, 1, 1], [], []>} : vector<8x128xbf16>, vector<8x128xbf16>, vector<128x128xf32> -> vector<128x128xf32>
    %9 = vector.extract_strided_slice %8 {offsets = [0, 0], sizes = [24, 128], strides = [1, 1]} : vector<128x128xf32> to vector<24x128xf32>
    %c0_4 = arith.constant 0 : index
    %c0_5 = arith.constant 0 : index
    %10 = vector.load %arg3[%c0_4, %c0_5] : memref<24x128xf32, #tpu.memory_space<vmem>>, vector<24x128xf32>
    tpu.vector_store %arg3[%c0_4, %c0_5], %9 {strides = array<i32>} : memref<24x128xf32, #tpu.memory_space<vmem>>, vector<24x128xf32>,
    return
  }
  func.func @transform_0(%arg0: i32) -> (i32, i32) {
    %c0_i32 = arith.constant 0 : i32
    %c0_i32_0 = arith.constant 0 : i32
    return %arg0, %c0_i32 : i32, i32
  }
  func.func @transform_1(%arg0: i32) -> (i32, i32) {
    %c0_i32 = arith.constant 0 : i32
    %c0_i32_0 = arith.constant 0 : i32
    %c0_i32_1 = arith.constant 0 : i32
    return %c0_i32, %c0_i32_0 : i32, i32
  }
  func.func @transform_2(%arg0: i32) -> (i32, i32) {
    %c0_i32 = arith.constant 0 : i32
    %c0_i32_0 = arith.constant 0 : i32
    return %arg0, %c0_i32 : i32, i32
  }
}

</mosaic_0001>

<bundles_post_ra>
// kernel: squeeze.22
= control target key start
LH: loop header
LB: loop body
LE: loop exit
PB: predicated region body
PF: predicated region fallthrough
CT: control target
= control target key end

     0   :  { %vm202_vm0 = vcmask 1045507   ;;  %s205_s9 = smov 192  ;;  %vm207_vm1 = vcmask 1047558   ;;  %s235_s26 = smov 3  ;;  %vm239_vm2 = vcmask 1044482   ;;  %vm243_vm3 = vcmask 1047557   ;;  %s632_s0 = inlined_call_operand.vmem [shape: f32[1,8,4,3,3], index: 0, kind: input, shape index: {}]   ;;  %s633_s1 = inlined_call_operand.vmem [shape: f32[24,12], index: 1, kind: output, shape index: {}]  }
   0x1   :  { %v405_v0 = vld [vmem:[%s632_s0 + $0x28] sm:$0xf]  ;;  %v406_v1 = vld [vmem:[%s632_s0 + $0x24] sm:$0xf]  ;;  %v408_v2 = vld [vmem:[%s632_s0 + $0x1c] sm:$0xf] }
   0x2   :  { %113 = vst [vmem:[#allocation0 + $0x50] sm:$0xf] %v405_v0  ;;  %118 = vst [vmem:[#allocation0 + $0x48] sm:$0xf] %v406_v1  ;;  %v409_v3 = vld [vmem:[%s632_s0 + $0x18] sm:$0xf] }
   0x3   :  { %128 = vst [vmem:[#allocation0 + $0x38] sm:$0xf] %v408_v2  ;;  %v410_v4 = vld [vmem:[%s632_s0 + $0x14] sm:$0xf]  ;;  %v412_v5 = vld [vmem:[%s632_s0 + $0xc] sm:$0xf] }
   0x4   :  { %133 = vst [vmem:[#allocation0 + $0x30] sm:$0xf] %v409_v3  ;;  %138 = vst [vmem:[#allocation0 + $0x28] sm:$0xf] %v410_v4  ;;  %v413_v6 = vld [vmem:[%s632_s0 + $0x8] sm:$0xf] }
   0x5   :  { %148 = vst [vmem:[#allocation0 + $0x18] sm:$0xf] %v412_v5  ;;  %v414_v7 = vld [vmem:[%s632_s0 + $0x4] sm:$0xf]  ;;  %153 = vst [vmem:[#allocation0 + $0x10] sm:$0xf] %v413_v6 }
   0x6   :  { %157 = vst [vmem:[#allocation0 + $0x8] sm:$0xf] %v414_v7  ;;  %v384_v8 = vld [vmem:[%s632_s0 + $0x7c] sm:$0xf]  ;;  %v385_v9 = vld [vmem:[%s632_s0 + $0x78] sm:$0xf] }
   0x7   :  { %8 = vst [vmem:[#allocation0 + $0xf8] sm:$0xf] %v384_v8  ;;  %13 = vst [vmem:[#allocation0 + $0xf0] sm:$0xf] %v385_v9  ;;  %v386_v10 = vld [vmem:[%s632_s0 + $0x74] sm:$0xf] }
   0x8   :  { %v388_v11 = vld [vmem:[%s632_s0 + $0x6c] sm:$0xf]  ;;  %v389_v12 = vld [vmem:[%s632_s0 + $0x68] sm:$0xf]  ;;  %18 = vst [vmem:[#allocation0 + $0xe8] sm:$0xf] %v386_v10 }
   0x9   :  { %28 = vst [vmem:[#allocation0 + $0xd8] sm:$0xf] %v388_v11  ;;  %33 = vst [vmem:[#allocation0 + $0xd0] sm:$0xf] %v389_v12  ;;  %v390_v13 = vld [vmem:[%s632_s0 + $0x64] sm:$0xf] }
   0xa   :  { %v391_v14 = vld [vmem:[%s632_s0 + $0x60] sm:$0xf]  ;;  %v392_v15 = vld [vmem:[%s632_s0 + $0x5c] sm:$0xf]  ;;  %38 = vst [vmem:[#allocation0 + $0xc8] sm:$0xf] %v390_v13 }
   0xb   :  { %43 = vst [vmem:[#allocation0 + $0xc0] sm:$0xf] %v391_v14  ;;  %48 = vst [vmem:[#allocation0 + $0xb8] sm:$0xf] %v392_v15  ;;  %v393_v16 = vld [vmem:[%s632_s0 + $0x58] sm:$0xf] }
   0xc   :  { %53 = vst [vmem:[#allocation0 + $0xb0] sm:$0xf] %v393_v16  ;;  %v395_v17 = vld [vmem:[%s632_s0 + $0x50] sm:$0xf]  ;;  %v396_v18 = vld [vmem:[%s632_s0 + $0x4c] sm:$0xf] }
   0xd   :  { %v397_v19 = vld [vmem:[%s632_s0 + $0x48] sm:$0xf]  ;;  %63 = vst [vmem:[#allocation0 + $0xa0] sm:$0xf] %v395_v17  ;;  %68 = vst [vmem:[#allocation0 + $0x98] sm:$0xf] %v396_v18 }
   0xe   :  { %73 = vst [vmem:[#allocation0 + $0x90] sm:$0xf] %v397_v19  ;;  %v399_v20 = vld [vmem:[%s632_s0 + $0x40] sm:$0xf]  ;;  %v400_v21 = vld [vmem:[%s632_s0 + $0x3c] sm:$0xf] }
   0xf   :  { %v401_v22 = vld [vmem:[%s632_s0 + $0x38] sm:$0xf]  ;;  %83 = vst [vmem:[#allocation0 + $0x80] sm:$0xf] %v399_v20  ;;  %88 = vst [vmem:[#allocation0 + $0x78] sm:$0xf] %v400_v21 }
  0x10   :  { %v201_v23 = vld [vmem:[#allocation0 + $0xd] ss:$9 sm:$0x38]   ;;  %93 = vst [vmem:[#allocation0 + $0x70] sm:$0xf] %v401_v22  ;;  %s431_s6 = smov 9  }
  0x11   :  { %v402_v24 = vld [vmem:[%s632_s0 + $0x34] sm:$0xf]  ;;  %v199_v25 = vld [vmem:[#allocation0 + $0x8] ss:$9 sm:$0x7]   ;;  %s293_s7 = smov 192 }
  0x12   :  { %v206_v26 = vld [vmem:[#allocation0 + $0x12] ss:$9 sm:%s205_s9]   ;;  %98 = vst [vmem:[#allocation0 + $0x68] sm:$0xf] %v402_v24  ;;  %v203_v27 = vsel %vm202_vm0, %v201_v23, %v199_v25  ;;  %v407_v32 = vld [vmem:[%s632_s0 + $0x20] sm:$0xf] }
  0x13   :  { %v403_v28 = vld [vmem:[%s632_s0 + $0x30] sm:$0xf]  ;;  %v404_v29 = vld [vmem:[%s632_s0 + $0x2c] sm:$0xf]  ;;  %v208_v31 = vsel %vm207_vm1, %v206_v26, %v203_v27  ;;  %123 = vst [vmem:[#allocation0 + $0x40] sm:$0xf] %v407_v32 }
  0x14   :  { %v387_v30 = vld [vmem:[%s632_s0 + $0x70] sm:$0xf]  ;;  %103 = vst [vmem:[#allocation0 + $0x60] sm:$0xf] %v403_v28  ;;  %108 = vst [vmem:[#allocation0 + $0x58] sm:$0xf] %v404_v29  ;;  %209 = vrot.lane.b32.xlu0 %v208_v31, %s431_s6 }
  0x15   :  { %23 = vst [vmem:[#allocation0 + $0xe0] sm:$0xf] %v387_v30  ;;  %v238_v33 = vld [vmem:[#allocation0 + $0xb6] ss:$9 sm:$0x1c]   ;;  %s271_s10 = smov 3 }
  0x16   :  { %v242_v34 = vld [vmem:[#allocation0 + $0xbb] ss:$9 sm:$0xe0]   ;;  %v287_v37 = vld [vmem:[#allocation0 + $0xb0] ss:$9 sm:$0x7]  }
  0x17   :  { %v236_v35 = vld [vmem:[#allocation0 + $0xb1] ss:$9 sm:%s235_s26]   ;;  %s540_s13 = smov 3  ;;  %s217_s18 = smov 12  ;;  %vm219_vm4 = vcmask 1043458   ;;  %vm223_vm5 = vcmask 1046532  }
  0x18   :  { %v240_v36 = vsel %vm239_vm2, %v238_v33, %v236_v35  ;;  %v411_v38 = vld [vmem:[%s632_s0 + $0x10] sm:$0xf]  ;;  %v158_v41 = vld [vmem:[%s632_s0] sm:$0xf]  ;;  %v394_v43 = vld [vmem:[%s632_s0 + $0x54] sm:$0xf] }
  0x19   :  { %v244_v39 = vsel %vm243_vm3, %v242_v34, %v240_v36  ;;  %v278_v40 = vld [vmem:[#allocation0 + $0x63] ss:$9 sm:$0xe0]   ;;  %143 = vst [vmem:[#allocation0 + $0x20] sm:$0xf] %v411_v38  ;;  %s251_s19 = smov 3 }
  0x1a   :  { %245 = vrot.lane.b32.xlu1 %v244_v39, %s431_s6  ;;  %v274_v42 = vld [vmem:[#allocation0 + $0x5e] ss:$9 sm:$0x1c]   ;;  %159 = vst [vmem:[#allocation0] sm:$0xf] %v158_v41  ;;  %s254_s20 = smov 12 }
  0x1b   :  { %v294_v44 = vld [vmem:[#allocation0 + $0xba] ss:$9 sm:%s293_s7]   ;;  %58 = vst [vmem:[#allocation0 + $0xa8] sm:$0xf] %v394_v43  ;;  %s334_s21 = smov 3  ;;  %s337_s22 = smov 12 }
  0x1c   :  { %v398_v45 = vld [vmem:[%s632_s0 + $0x44] sm:$0xf]  ;;  %s214_s0 = smov 3  ;;  %v289_v47 = vld [vmem:[#allocation0 + $0xb5] ss:$9 sm:$0x38]  }
  0x1d   :  { %v272_v46 = vld [vmem:[#allocation0 + $0x59] ss:$9 sm:%s271_s10]   ;;  %78 = vst [vmem:[#allocation0 + $0x88] sm:$0xf] %v398_v45  ;;  %v291_v49 = vsel %vm202_vm0, %v289_v47, %v287_v37  ;;  %v215_v53 = vld [vmem:[#allocation0 + $0x5a] ss:$14 sm:%s214_s0]  }
  0x1e   :  { %v276_v48 = vsel %vm239_vm2, %v274_v42, %v272_v46  ;;  %v296_v51 = vsel %vm207_vm1, %v294_v44, %v291_v49  ;;  %v310_v52 = vld [vmem:[#allocation0 + $0xb] ss:$9 sm:$0xe0]   ;;  %v218_v54 = vld [vmem:[#allocation0 + $0x5f] ss:$9 sm:%s217_s18]   ;;  %s432_s23 = smov 6  }
  0x1f   :  { %v280_v50 = vsel %vm243_vm3, %v278_v40, %v276_v48  ;;  %297 = vrot.lane.b32.xlu1 %v296_v51, %s432_s23  ;;  %v259_v55 = vld [vmem:[#allocation0 + $0xc] ss:$9 sm:$0x70]   ;;  %v338_v57 = vld [vmem:[#allocation0 + $0xaf] ss:$9 sm:%s337_s22]   ;;  %s324_s24 = smov 192  ;;  %v220_v62 = vsel %vm219_vm4, %v218_v54, %v215_v53 }
  0x20   :  { %281 = vrot.lane.b32.xlu0 %v280_v50, %s432_s23  ;;  %v263_v56 = vld [vmem:[#allocation0 + $0x49] sm:$0x80]   ;;  %v306_v58 = vld [vmem:[#allocation0 + $0x6] ss:$9 sm:$0x1c]   ;;  %vm227_vm6 = vcmask 1047559  }
  0x21   :  { %v255_v59 = vld [vmem:[#allocation0 + $0x7] ss:$9 sm:%s254_s20]   ;;  %v304_v60 = vld [vmem:[#allocation0 + $0x1] ss:$9 sm:%s540_s13]   ;;  %vm161_vm7 = vcmask 23552   ;;  %s433_s25 = smov 3  }
  0x22   :  { %v252_v61 = vld [vmem:[#allocation0 + $0x2] ss:$14 sm:%s251_s19]   ;;  %v342_v63 = vld [vmem:[#allocation0 + $0xb4] ss:$9 sm:$0x70]   ;;  %v308_v0 = vsel %vm239_vm2, %v306_v58, %v304_v60  ;;  %vm211_vm8 = vcmask 97352  }
  0x23   :  { %v257_v1 = vsel %vm219_vm4, %v255_v59, %v252_v61  ;;  %v226_v2 = vld [vmem:[#allocation0 + $0xa1] sm:$0x80]   ;;  %v335_v3 = vld [vmem:[#allocation0 + $0xaa] ss:$14 sm:%s334_s21]   ;;  %v312_v5 = vsel %vm243_vm3, %v310_v52, %v308_v0  ;;  %vm268_vm9 = vcmask 72752   ;;  %vm315_vm10 = vcmask 48152  }
  0x24   :  { %v325_v4 = vld [vmem:[#allocation0 + $0x62] ss:$9 sm:%s324_s24]   ;;  %v261_v6 = vsel %vm223_vm5, %v259_v55, %v257_v1  ;;  %v222_v7 = vld [vmem:[#allocation0 + $0x64] ss:$9 sm:$0x70]   ;;  %v340_v8 = vsel %vm219_vm4, %v338_v57, %v335_v3  ;;  %313 = vrot.lane.b32.xlu0 %v312_v5, %s433_s25 }
  0x25   :  { %v318_v9 = vld [vmem:[#allocation0 + $0x58] ss:$9 sm:$0x7]   ;;  %v265_v10 = vsel %vm227_vm6, %v263_v56, %v261_v6  ;;  %v224_v11 = vsel %vm223_vm5, %v222_v7, %v220_v62  ;;  %v174_v14 = vld [vmem:[#allocation0 + $0x60] ss:$9 sm:$0x7]   ;;  %v344_v19 = vsel %vm223_vm5, %v342_v63, %v340_v8 }
  0x26   :  { %v346_v12 = vld [vmem:[#allocation0 + $0xf1] sm:$0x80]   ;;  %266 = vrot.lane.b32.xlu1 %v265_v10, %s432_s23  ;;  %v228_v15 = vsel %vm227_vm6, %v226_v2, %v224_v11  ;;  %417 = vst.msk [vmem:[%s633_s1 + $0x9] sm:$0x7] %vm161_vm7, %v174_v14  }
  0x27   :  { %v320_v13 = vld [vmem:[#allocation0 + $0x5d] ss:$9 sm:$0x38]   ;;  %v179_v17 = vld [vmem:[#allocation0 + $0x80] ss:$9 sm:$0x7]   ;;  %v348_v26 = vsel %vm227_vm6, %v346_v12, %v344_v19 }
  0x28   :  { %v322_v16 = vsel %vm202_vm0, %v320_v13, %v318_v9  ;;  %v184_v18 = vld [vmem:[#allocation0 + $0xa0] ss:$9 sm:$0x7]   ;;  %418 = vst.msk [vmem:[%s633_s1 + $0xc] sm:$0x7] %vm161_vm7, %v179_v17   ;;  %229 = vrot.lane.b32.xlu0 %v228_v15, %s431_s6 }
  0x29   :  { %v327_v20 = vsel %vm207_vm1, %v325_v4, %v322_v16  ;;  %419 = vst.msk [vmem:[%s633_s1 + $0xf] sm:$0x7] %vm161_vm7, %v184_v18   ;;  %v189_v21 = vld [vmem:[#allocation0 + $0xc0] ss:$9 sm:$0x7]  }
  0x2a   :  { %v194_v22 = vld [vmem:[#allocation0 + $0xe0] ss:$9 sm:$0x7]   ;;  %420 = vst.msk [vmem:[%s633_s1 + $0x12] sm:$0x7] %vm161_vm7, %v189_v21   ;;  %328 = vrot.lane.b32.xlu1 %v327_v20, %s433_s25 }
  0x2b   :  { %421 = vst.msk [vmem:[%s633_s1 + $0x15] sm:$0x7] %vm161_vm7, %v194_v22   ;;  %v160_v23 = vld [vmem:[#allocation0] ss:$9 sm:$0x7]  }
  0x2c   :  { %v164_v24 = vld [vmem:[#allocation0 + $0x20] ss:$9 sm:$0x7]   ;;  %162 = vst.msk [vmem:[%s633_s1] sm:$0x7] %vm161_vm7, %v160_v23   ;;  %349 = vrot.lane.b32.xlu0 %v348_v26, %s433_s25 }
  0x2d   :  { %415 = vst.msk [vmem:[%s633_s1 + $0x3] sm:$0x7] %vm161_vm7, %v164_v24   ;;  %v169_v25 = vld [vmem:[#allocation0 + $0x40] ss:$9 sm:$0x7]  }
  0x2e   :  { %416 = vst.msk [vmem:[%s633_s1 + $0x6] sm:$0x7] %vm161_vm7, %v169_v25  }
  0x86   :  { %v210_v27 = vpop.permute.xlu0 %209  }
  0x87   :  { %212 = vst.msk [vmem:[%s633_s1] sm:$0xff] %vm211_vm8, %v210_v27  }
  0x8c   :  { %v246_v28 = vpop.permute.xlu1 %245  }
  0x8d   :  { %423 = vst.msk [vmem:[%s633_s1 + $0x10] sm:$0xff] %vm211_vm8, %v246_v28  }
  0x91   :  { %v298_v30 = vpop.permute.xlu1 %297  }
  0x92   :  { %v282_v29 = vpop.permute.xlu0 %281   ;;  %425 = vst.msk [vmem:[%s633_s1 + $0x10] sm:$0xff] %vm268_vm9, %v298_v30  }
  0x96   :  { %v314_v31 = vpop.permute.xlu0 %313  }
  0x98   :  { %v267_v32 = vpop.permute.xlu1 %266  }
  0x99   :  { %269 = vst.msk [vmem:[%s633_s1] sm:$0xff] %vm268_vm9, %v267_v32  }
  0x9a   :  { %316 = vst.msk [vmem:[%s633_s1] sm:$0xff] %vm315_vm10, %v314_v31   ;;  %v230_v33 = vpop.permute.xlu0 %229  }
  0x9b   :  { %422 = vst.msk [vmem:[%s633_s1 + $0x8] sm:$0xff] %vm211_vm8, %v230_v33  }
  0x9c   :  { %v329_v34 = vpop.permute.xlu1 %328   ;;  %424 = vst.msk [vmem:[%s633_s1 + $0x8] sm:$0xff] %vm268_vm9, %v282_v29  }
  0x9d   :  { %426 = vst.msk [vmem:[%s633_s1 + $0x8] sm:$0xff] %vm315_vm10, %v329_v34  }
  0x9e   :  { %v350_v35 = vpop.permute.xlu0 %349  }
  0x9f   :  { %427 = vst.msk [vmem:[%s633_s1 + $0x10] sm:$0xff] %vm315_vm10, %v350_v35  }

// kernel: custom-call.32
= control target key start
LH: loop header
LB: loop body
LE: loop exit
PB: predicated region body
PF: predicated region fallthrough
CT: control target
= control target key end

     0   :  { %v469_v3 = vmov 0.0   ;;  %s495_s15 = smov 0   ;;  %s607_s0 = inlined_call_operand.vmem [shape: f32[24,12], index: 0, kind: input, shape index: {}]   ;;  %s608_s1 = inlined_call_operand.vmem [shape: f32[24,12], index: 1, kind: output, shape index: {0}]   ;;  %s609_s2 = inlined_call_operand.vmem [shape: f32[12], index: 2, kind: output, shape index: {1}]  }
   0x1   :  { %v35_v0 = vld [vmem:[%s607_s0] sm:$0xff]  ;;  %v37_v1 = vld [vmem:[%s607_s0 + $0x8] sm:$0xff]  ;;  %v39_v2 = vld [vmem:[%s607_s0 + $0x10] sm:$0xff]  ;;  %54 = vst [vmem:[#allocation2] sm:$0x1] %v469_v3 }
   0x2   :  { %45 = vst [vmem:[#allocation1] sm:$0xff] %v35_v0  ;;  %49 = vst [vmem:[#allocation1 + $0x8] sm:$0xff] %v37_v1 }
   0x3   :  { %53 = vst [vmem:[#allocation1 + $0x10] sm:$0xff] %v39_v2 }
   0x4 LB: > { %v62_v4 = vlaneseq  ;;  %v504_v7 = vstv %s467_s15  ;;  %s109_s0 = scalar_lea.vmem [#allocation1], %s467_s15  ;;  %s145_s16 = smov [#allocation1]  ;;  %s467_s15 = sphi %s495_s15, %s60_s15  }
   0x5   : > { %s203_s17 = scalar_lea.vmem [#allocation4], %s467_s15  ;;  %s219_s18 = smov [#allocation1] }
   0x6   : > { %v501_v6 = vshrl.u32 %v62_v4, 7  ;;  %v533_v63 = vand.u32 127, %v62_v4  ;;  %s220_s19 = smov [#allocation4] }
   0x8   : > { %vm66_vm0 = vcmp.gt.s32.totalorder %v501_v6, %v504_v7  ;;  %v73_v9 = vadd.s32 8, %v501_v6  ;;  %v83_v11 = vadd.s32 16, %v501_v6  ;;  %v148_v6 = vmov %v501_v6 }
   0x9   : > { %v61_v5 = vld [vmem:[#allocation1] sm:$0xff]  ;;  %v70_v8 = vld [vmem:[#allocation1 + $0x8] sm:$0xff]  ;;  %v185_v56 = vadd.s32 16, %v148_v6  ;;  %v167_v57 = vadd.s32 8, %v148_v6  ;;  %vm152_vm11 = vcmp.gt.s32.totalorder %v148_v6, %v504_v7  ;;  %vm537_vm14 = vcmp.eq.s32.totalorder %v533_v63, %v504_v7 }
   0xa   : > { %v80_v10 = vld [vmem:[#allocation1 + $0x10] sm:$0xff]  ;;  %v67_v12 = vsel %vm66_vm0, %v61_v5, 0.0  ;;  %vm75_vm1 = vcmp.gt.s32.totalorder %v73_v9, %v504_v7  ;;  %vm85_vm2 = vcmp.gt.s32.totalorder %v83_v11, %v504_v7  ;;  %v110_v26 = vld [vmem:[%s109_s0] ss:$0 sm:$0xff]  ;;  %v429_v60 = vld [vmem:[%s145_s16 + $0x8] sm:$0xff]  ;;  %v223_v6 = vmov %v501_v6 }
   0xb   : > { %v68_v13 = vmul.f32 %v67_v12, %v67_v12  ;;  %v76_v14 = vsel %vm75_vm1, %v70_v8, 0.0  ;;  %v88_v15 = vsel %vm85_vm2, %v80_v10, 0.0  ;;  %v111_v27 = vand.u32 2147483647, %v110_v26  ;;  %v149_v58 = vld [vmem:[%s145_s16] sm:$0xff]  ;;  %v430_v59 = vld [vmem:[%s145_s16 + $0x10] sm:$0xff] }
   0xc   : > { %v77_v16 = vmul.f32 %v76_v14, %v76_v14  ;;  %v89_v17 = vmul.f32 %v88_v15, %v88_v15  ;;  %vm136_vm8 = vcmp.lt.f32.partialorder %v110_v26, 0.0  ;;  %vm187_vm9 = vcmp.gt.s32.totalorder %v185_v56, %v504_v7 }
   0xd   : > { %v112_v32 = vmax.f32 %v111_v27, 0.0  ;;  %vm188_vm10 = vcmp.lt.s32.totalorder %v185_v56, 24  ;;  %vm169_vm13 = vcmp.gt.s32.totalorder %v167_v57, %v504_v7  ;;  %v153_v0 = vsel %vm152_vm11, %v149_v58, 0.0 }
   0xe   : > { %v78_v18 = vadd.f32 %v77_v16, %v68_v13  ;;  %vm189_vm12 = vmand %vm187_vm9, %vm188_vm10  ;;  %v170_v2 = vsel %vm169_vm13, %v429_v60, 0.0 }
   0xf   : > { %v190_v1 = vsel %vm189_vm12, %v430_v59, 0.0 }
  0x10   : > { %v90_v19 = vadd.f32 %v89_v17, %v78_v18 }
  0x12   : > { %v91_v20 = vrot.slane %v90_v19, 4 }
  0x14   : > { %v92_v21 = vadd.f32 %v91_v20, %v90_v19 }
  0x16   : > { %v93_v22 = vrot.slane %v92_v21, 2 }
  0x18   : > { %v94_v23 = vadd.f32 %v93_v22, %v92_v21  ;;  %v216_v21 = vld [vmem:[#allocation2] ss:$0 sm:$0xff] }
  0x1a   : > { %v95_v24 = vrot.slane %v94_v23, 1 }
  0x1c   : > { %v512_v25 = vadd.f32 %v95_v24, %v94_v23 }
  0x1e   : > { %451 = vrsqrt.f32 %v512_v25  ;;  %vm99_vm3 = vcmp.eq.f32.partialorder %v512_v25, inf  ;;  %v102_v29 = vand.u32 2147483648, %v512_v25  ;;  %vm101_vm4 = vcmp.eq.f32.partialorder %v512_v25, 0.0 }
  0x28   : > { %v452_v28 = vpop.eup %451 }
  0x29   : > { %v98_v30 = vmul.f32 %v452_v28, %v512_v25  ;;  %v432_v28 = vld [vmem:[%s219_s18 + $0x8] sm:$0xff] }
  0x2b   : > { %v100_v31 = vsel %vm99_vm3, %v512_v25, %v98_v30  ;;  %v470_v25 = vmov 1.0  }
  0x2c   : > { %v103_v33 = vsel %vm101_vm4, %v102_v29, %v100_v31  ;;  %v434_v29 = vld [vmem:[%s219_s18 + $0x10] sm:$0xff] }
  0x2d   : > { %v113_v34 = vand.u32 2147483647, %v103_v33 }
  0x2f   : > { %v114_v35 = vmax.f32 %v112_v32, %v113_v34 }
  0x31   : > { %453 = vrcp.f32 %v114_v35  ;;  %vm126_vm7 = vcmp.eq.f32.partialorder %v114_v35, 0.0 }
  0x3b   : > { %v454_v36 = vpop.eup %453 }
  0x3c   : > { %v116_v37 = vmul.f32 %v454_v36, %v111_v27  ;;  %v119_v38 = vmul.f32 0.0, %v454_v36  ;;  %v123_v39 = vmul.f32 %v454_v36, %v113_v34  ;;  %v226_v27 = vld [vmem:[%s219_s18] sm:$0xff]  ;;  %s562_s18 = smov %s219_s18 }
  0x3d   : > { %s317_s20 = scalar_lea.vmem %s562_s18, %s467_s15  ;;  %s60_s15 = sadd.s32 1, %s467_s15  }
  0x3e   : > { %v117_v40 = vmul.f32 %v116_v37, %v116_v37  ;;  %v120_v41 = vmul.f32 %v119_v38, %v119_v38  ;;  %v124_v42 = vmul.f32 %v123_v39, %v123_v39  ;;  %p57_p0 = scmp.ge.s32.totalorder %s60_s15, 12  }
  0x40   : > { %v121_v43 = vadd.f32 %v120_v41, %v117_v40 }
  0x42   : > { %v125_v44 = vadd.f32 %v124_v42, %v121_v43 }
  0x44   : > { %455 = vrsqrt.f32 %v125_v44  ;;  %vm129_vm5 = vcmp.eq.f32.partialorder %v125_v44, inf  ;;  %v132_v46 = vand.u32 2147483648, %v125_v44  ;;  %vm131_vm6 = vcmp.eq.f32.partialorder %v125_v44, 0.0 }
  0x4e   : > { %v456_v45 = vpop.eup %455 }
  0x4f   : > { %v128_v47 = vmul.f32 %v456_v45, %v125_v44 }
  0x51   : > { %v130_v48 = vsel %vm129_vm5, %v125_v44, %v128_v47  ;;  %v261_v47 = vld [vmem:[%s562_s18] sm:$0xff] }
  0x52   : > { %v133_v49 = vsel %vm131_vm6, %v132_v46, %v130_v48  ;;  %v436_v48 = vld [vmem:[%s562_s18 + $0x8] sm:$0xff] }
  0x53   : > { %v134_v50 = vmul.f32 %v133_v49, %v114_v35  ;;  %v439_v49 = vld [vmem:[%s562_s18 + $0x10] sm:$0xff] }
  0x55   : > { %v135_v51 = vsel %vm126_vm7, 0.0, %v134_v50 }
  0x56   : > { %v137_v52 = vxor.u32 2147483648, %v135_v51 }
  0x58   : > { %v138_v53 = vsel %vm136_vm8, %v135_v51, %v137_v52 }
  0x59   : > { %v526_v54 = vsel %vm101_vm4, %v110_v26, %v138_v53  ;;  %457 = vrcp.f32 %v138_v53  ;;  %v139_v61 = vsub.f32 %v138_v53, %v110_v26 }
  0x5a   : > { %v144_v55 = vsub.f32 %v110_v26, %v526_v54  ;;  %v235_v26 = vadd.s32 16, %v223_v6  ;;  %v254_v6 = vmov %v501_v6 }
  0x5b   : > { %v275_v44 = vadd.s32 8, %v254_v6  ;;  %v296_v45 = vadd.s32 16, %v254_v6  ;;  %vm271_vm0 = vcmp.ge.s32.totalorder %v254_v6, %v504_v7 }
  0x5c   : > { %459 = vrcp.f32 %v144_v55  ;;  %vm241_vm15 = vcmp.lt.s32.totalorder %v235_v26, 24  ;;  %vm572_vm3 = vmand %vm537_vm14, %vm271_vm0 }
  0x5d   : > { %vm292_vm1 = vcmp.ge.s32.totalorder %v275_v44, %v504_v7  ;;  %vm313_vm2 = vcmp.ge.s32.totalorder %v296_v45, %v504_v7 }
  0x5e   : > { %vm293_vm5 = vmand %vm537_vm14, %vm292_vm1 }
  0x5f   : > { %vm314_vm6 = vmand %vm537_vm14, %vm313_vm2 }
  0x63   : > { %v458_v62 = vpop.eup %457 }
  0x64   : > { %v141_v3 = vmul.f32 %v458_v62, %v139_v61 }
  0x66   : > { %v460_v5 = vpop.eup %459  ;;  %v143_v14 = vsel %vm101_vm4, 0.0, %v141_v3 }
  0x67   : > { %v155_v8 = vmul.f32 %v460_v5, %v153_v0  ;;  %v192_v10 = vmul.f32 %v460_v5, %v190_v1  ;;  %v172_v11 = vmul.f32 %v460_v5, %v170_v2  ;;  %v209_v18 = vsel %vm537_vm14, %v143_v14, 0.0 }
  0x69   : > { %v156_v12 = vsel %vm101_vm4, 0.0, %v155_v8  ;;  %v193_v4 = vsel %vm101_vm4, 0.0, %v192_v10  ;;  %v173_v13 = vsel %vm101_vm4, 0.0, %v172_v11  ;;  %vm263_vm4 = vcmp.gt.s32.totalorder %v533_v63, %v504_v7 }
  0x6a   : > { %v161_v15 = vsel %vm537_vm14, %v156_v12, 0.0  ;;  %v198_v16 = vsel %vm537_vm14, %v193_v4, 0.0  ;;  %v178_v17 = vsel %vm537_vm14, %v173_v13, 0.0 }
  0x6b   : > { %162 = vadd.xlane.f32.xlu0 %v161_v15  ;;  %199 = vadd.xlane.f32.xlu1 %v198_v16 }
  0x6f   : > { %179 = vadd.xlane.f32.xlu0 %v178_v17  ;;  %210 = vadd.xlane.f32.xlu1 %v209_v18 }
  0xf8   : > { %v163_v19 = vpop.xlane.xlu0 %162  ;;  %v200_v20 = vpop.xlane.xlu1 %199 }
  0xf9   : > { %164 = vst [vmem:[#allocation4] sm:$0xff] %v163_v19  ;;  %202 = vst [vmem:[#allocation4 + $0x10] sm:$0xff] %v200_v20 }
  0xfc   : > { %v180_v22 = vpop.xlane.xlu0 %179  ;;  %v211_v23 = vpop.xlane.xlu1 %210 }
  0xfd   : > { %182 = vst [vmem:[#allocation4 + $0x8] sm:$0xff] %v180_v22  ;;  %v217_v24 = vsel %vm537_vm14, %v211_v23, %v216_v21 }
  0xfe   : > { %204 = vst [vmem:[%s203_s17] sm:$0x1] %v470_v25  ;;  %218 = vst [vmem:[#allocation2] sm:$0x1] %v217_v24 }
 0x105   : > { %v225_v30 = vld [vmem:[%s220_s19] sm:$0xff]  ;;  %v431_v31 = vld [vmem:[%s220_s19 + $0x8] sm:$0xff]  ;;  %v433_v32 = vld [vmem:[%s220_s19 + $0x10] sm:$0xff]  ;;  %s251_s19 = smov %s220_s19 }
 0x106   : > { %v227_v33 = vmul.f32 %v226_v27, %v225_v30  ;;  %v233_v34 = vmul.f32 %v432_v28, %v431_v31  ;;  %v240_v35 = vmul.f32 %v434_v29, %v433_v32  ;;  %v259_v51 = vld [vmem:[%s251_s19] sm:$0xff]  ;;  %v435_v52 = vld [vmem:[%s251_s19 + $0x8] sm:$0xff]  ;;  %v438_v53 = vld [vmem:[%s251_s19 + $0x10] sm:$0xff] }
 0x107   :  { %v328_v5 = vld [vmem:[#allocation2] sm:$0x1] (%p57_p0) }
 0x108   : > { %v234_v36 = vadd.f32 %v233_v34, %v227_v33  ;;  %v242_v37 = vsel %vm241_vm15, %v240_v35, 0.0  ;;  %330 = vst [vmem:[#allocation3] sm:$0x1] (%p57_p0), %v328_v5 }
 0x10a   : > { %v243_v38 = vadd.f32 %v242_v37, %v234_v36 }
 0x10c   : > { %v244_v39 = vrot.slane %v243_v38, 4 }
 0x10e   : > { %v245_v40 = vadd.f32 %v244_v39, %v243_v38 }
 0x10f   :  { %v388_v9 = vld [vmem:[#allocation3] sm:$0x1] (%p57_p0) }
 0x110   : > { %v246_v41 = vrot.slane %v245_v40, 2  ;;  %389 = vst [vmem:[%s609_s2] sm:$0x1] (%p57_p0), %v388_v9 }
 0x112   : > { %v247_v42 = vadd.f32 %v246_v41, %v245_v40 }
 0x114   : > { %v248_v43 = vrot.slane %v247_v42, 1 }
 0x116   : > { %v249_v46 = vadd.f32 %v248_v43, %v247_v42 }
 0x118   : > { %v255_v50 = vmul.f32 %v249_v46, %v211_v23 }
 0x11a   : > { %v260_v56 = vmul.f32 %v259_v51, %v255_v50  ;;  %v280_v6 = vmul.f32 %v435_v52, %v255_v50  ;;  %v301_v57 = vmul.f32 %v438_v53, %v255_v50 }
 0x11c   : > { %v264_v58 = vsub.f32 %v261_v47, %v260_v56  ;;  %v285_v59 = vsub.f32 %v436_v48, %v280_v6  ;;  %v306_v60 = vsub.f32 %v439_v49, %v301_v57 }
 0x11e   : > { %v265_v61 = vsel %vm263_vm4, %v264_v58, %v261_v47  ;;  %v286_v62 = vsel %vm263_vm4, %v285_v59, %v436_v48  ;;  %v307_v0 = vsel %vm263_vm4, %v306_v60, %v439_v49 }
 0x11f   : > { %v273_v1 = vsel %vm572_vm3, %v259_v51, %v265_v61  ;;  %v294_v2 = vsel %vm293_vm5, %v435_v52, %v286_v62  ;;  %v315_v3 = vsel %vm314_vm6, %v438_v53, %v307_v0 }
 0x120   : > { %274 = vst [vmem:[%s562_s18] sm:$0xff] %v273_v1  ;;  %437 = vst [vmem:[%s562_s18 + $0x8] sm:$0xff] %v294_v2 }
 0x121   : > { %440 = vst [vmem:[%s562_s18 + $0x10] sm:$0xff] %v315_v3 }
 0x124   :  { %59 = sbr.rel (!%p57_p0) target bundleno = 4 (0x4), region = 157 }
 0x128   : > { %v318_v7 = vld [vmem:[%s317_s20] ss:$0 sm:$0xff] }
 0x129   : > { %v323_v63 = vsel %vm537_vm14, %v526_v54, %v318_v7 }
 0x12a   : > { %324 = vst [vmem:[%s317_s20] sm:$0x1] %v323_v63 }
 0x131   :  { %v362_v8 = vld [vmem:[#allocation1] sm:$0xff]  ;;  %v364_v10 = vld [vmem:[#allocation1 + $0x8] sm:$0xff]  ;;  %v366_v54 = vld [vmem:[#allocation1 + $0x10] sm:$0xff] }
 0x132   :  { %363 = vst [vmem:[%s608_s1] sm:$0xff] %v362_v8  ;;  %365 = vst [vmem:[%s608_s1 + $0x8] sm:$0xff] %v364_v10 }
 0x133   :  { %367 = vst [vmem:[%s608_s1 + $0x10] sm:$0xff] %v366_v54 }

// kernel: custom-call.49
= control target key start
LH: loop header
LB: loop body
LE: loop exit
PB: predicated region body
PF: predicated region fallthrough
CT: control target
= control target key end

     0   :  { %s573_s0 = inlined_call_operand.vmem [shape: f32[12,12], index: 0, kind: input, shape index: {}]   ;;  %s574_s1 = inlined_call_operand.vmem [shape: f32[12,12], index: 1, kind: output, shape index: {}]  }
   0x1   :  { %s15_s8 = scalar_lea.vmem %s573_s0, 8 }
   0x2   :  { %p305_p0 = scmp.gt.s32.totalorder %s573_s0, %s15_s8 }
   0x3   :  { %s507_s11 = smov (!%p305_p0), [#allocation0]   ;;  %s511_s14 = smov (!%p305_p0), %s573_s0  }
   0x4   :  { %306 = sbr.rel (%p305_p0) target bundleno = 21 (0x15), region = 86 }
   0xb LB: > { %v49_v0 = vld [vmem:[%s513_s14] sm:$0xff]  ;;  %s51_s14 = scalar_lea.vmem %s513_s14, 8   ;;  %s513_s14 = sphi %s511_s14, %s51_s14   ;;  %s509_s11 = sphi %s507_s11, %s52_s11  }
   0xc   : > { %50 = vst [vmem:[%s509_s11] sm:$0xff] %v49_v0  ;;  %s52_s11 = scalar_lea.vmem %s509_s11, 8   ;;  %p46_p1 = scmp.gt.s32.totalorder %s51_s14, %s15_s8 }
   0xe   :  { %48 = sbr.rel (!%p46_p1) target bundleno = 11 (0xb), region = 92 }
  0x15 PF:  { %v64_v1 = vlaneseq  ;;  %v84_v2 = vld [vmem:[#allocation0 + $0x1] ss:$0 sm:$0xff]  ;;  %vm85_vm0 = vcmask 97280   ;;  %v95_v10 = vld [vmem:[#allocation0 + $0x2] ss:$0 sm:$0xff]  ;;  %v523_v41 = vmov 0.0   ;;  %s515_s16 = smov %s574_s1  }
  0x16   :  { %v70_v5 = vld [vmem:[#allocation0] sm:$0xff]  ;;  %v86_v6 = vsel %vm85_vm0, %v84_v2, 0.0  ;;  %v97_v11 = vsel %vm85_vm0, %v95_v10, 0.0  ;;  %v161_v37 = vld [vmem:[#allocation0 + $0x8] ss:$0 sm:$0xff]  ;;  %s519_s17 = smov [#allocation1]  }
  0x17   :  { %v543_v3 = vand.u32 127, %v64_v1  ;;  %v67_v4 = vshrl.u32 %v64_v1, 7  ;;  %v106_v15 = vld [vmem:[#allocation0 + $0x3] ss:$0 sm:$0xff]  ;;  %v117_v20 = vld [vmem:[#allocation0 + $0x4] ss:$0 sm:$0xff] }
  0x18   :  { %v108_v16 = vsel %vm85_vm0, %v106_v15, 0.0  ;;  %v119_v21 = vsel %vm85_vm0, %v117_v20, 0.0  ;;  %v128_v25 = vld [vmem:[#allocation0 + $0x5] ss:$0 sm:$0xff]  ;;  %v139_v30 = vld [vmem:[#allocation0 + $0x6] ss:$0 sm:$0xff] }
  0x19   :  { %vm69_vm1 = vcmp.eq.s32.totalorder %v543_v3, %v67_v4  ;;  %vm73_vm2 = vcmp.eq.s32.totalorder %v543_v3, 0  ;;  %vm89_vm3 = vcmp.eq.s32.totalorder %v543_v3, 1  ;;  %vm100_vm4 = vcmp.eq.s32.totalorder %v543_v3, 2  ;;  %v150_v36 = vld [vmem:[#allocation0 + $0x7] ss:$0 sm:$0xff] }
  0x1a   :  { %v74_v7 = vsel %vm73_vm2, %v70_v5, 1.0  ;;  %vm111_vm5 = vcmp.eq.s32.totalorder %v543_v3, 3  ;;  %vm122_vm6 = vcmp.eq.s32.totalorder %v543_v3, 4  ;;  %v130_v26 = vsel %vm85_vm0, %v128_v25, 0.0  ;;  %v176_v47 = vld [vmem:[#allocation0 + $0x9] ss:$0 sm:$0xff] }
  0x1b   :  { %v75_v8 = vsel %vm69_vm1, %v74_v7, 0.0  ;;  %vm133_vm7 = vcmp.eq.s32.totalorder %v543_v3, 5  ;;  %v141_v31 = vsel %vm85_vm0, %v139_v30, 0.0  ;;  %v80_v35 = vadd.s32 8, %v67_v4  ;;  %v191_v55 = vld [vmem:[#allocation0 + $0xa] ss:$0 sm:$0xff] }
  0x1c   :  { %v90_v9 = vmul.f32 %v86_v6, %v75_v8  ;;  %vm144_vm8 = vcmp.eq.s32.totalorder %v543_v3, 6  ;;  %v152_v38 = vsel %vm85_vm0, %v150_v36, 0.0  ;;  %v163_v43 = vsel %vm85_vm0, %v161_v37, 0.0  ;;  %v206_v63 = vld [vmem:[#allocation0 + $0xb] ss:$0 sm:$0xff] }
  0x1d   :  { %vm81_vm9 = vcmp.eq.s32.totalorder %v543_v3, %v80_v35  ;;  %vm155_vm10 = vcmp.eq.s32.totalorder %v543_v3, 7  ;;  %vm166_vm11 = vcmp.eq.s32.totalorder %v543_v3, 8  ;;  %v178_v50 = vsel %vm85_vm0, %v176_v47, 0.0 }
  0x1e   :  { %91 = vadd.xlane.f32.xlu0 %v90_v9  ;;  %v82_v42 = vsel %vm81_vm9, 1.0, %v523_v41  ;;  %vm181_vm12 = vcmp.eq.s32.totalorder %v543_v3, 9  ;;  %v193_v58 = vsel %vm85_vm0, %v191_v55, 0.0  ;;  %vm196_vm13 = vcmp.eq.s32.totalorder %v543_v3, 10 }
  0x1f   :  { %v171_v45 = vmul.f32 %v163_v43, %v82_v42  ;;  %v208_v2 = vsel %vm85_vm0, %v206_v63, 0.0  ;;  %vm211_vm14 = vcmp.eq.s32.totalorder %v543_v3, 11 }
  0xab   :  { %v92_v12 = vpop.xlane.xlu0 %91 }
  0xac   :  { %v93_v13 = vsel %vm89_vm3, %v92_v12, %v75_v8 }
  0xad   :  { %v101_v14 = vmul.f32 %v97_v11, %v93_v13 }
  0xaf   :  { %102 = vadd.xlane.f32.xlu0 %v101_v14 }
 0x13c   :  { %v103_v17 = vpop.xlane.xlu0 %102 }
 0x13d   :  { %v104_v18 = vsel %vm100_vm4, %v103_v17, %v93_v13 }
 0x13e   :  { %v112_v19 = vmul.f32 %v108_v16, %v104_v18 }
 0x140   :  { %113 = vadd.xlane.f32.xlu1 %v112_v19 }
 0x1cd   :  { %v114_v22 = vpop.xlane.xlu1 %113 }
 0x1ce   :  { %v115_v23 = vsel %vm111_vm5, %v114_v22, %v104_v18 }
 0x1cf   :  { %v123_v24 = vmul.f32 %v119_v21, %v115_v23 }
 0x1d1   :  { %124 = vadd.xlane.f32.xlu1 %v123_v24 }
 0x25e   :  { %v125_v27 = vpop.xlane.xlu1 %124 }
 0x25f   :  { %v126_v28 = vsel %vm122_vm6, %v125_v27, %v115_v23 }
 0x260   :  { %v134_v29 = vmul.f32 %v130_v26, %v126_v28 }
 0x262   :  { %135 = vadd.xlane.f32.xlu0 %v134_v29 }
 0x2ef   :  { %v136_v32 = vpop.xlane.xlu0 %135 }
 0x2f0   :  { %v137_v33 = vsel %vm133_vm7, %v136_v32, %v126_v28 }
 0x2f1   :  { %v145_v34 = vmul.f32 %v141_v31, %v137_v33 }
 0x2f3   :  { %146 = vadd.xlane.f32.xlu1 %v145_v34 }
 0x380   :  { %v147_v39 = vpop.xlane.xlu1 %146 }
 0x381   :  { %v148_v40 = vsel %vm144_vm8, %v147_v39, %v137_v33 }
 0x382   :  { %v156_v44 = vmul.f32 %v152_v38, %v148_v40 }
 0x384   :  { %157 = vadd.xlane.f32.xlu0 %v156_v44 }
 0x388   :  { %172 = vadd.xlane.f32.xlu0 %v171_v45 }
 0x411   :  { %v158_v46 = vpop.xlane.xlu0 %157 }
 0x412   :  { %v159_v48 = vsel %vm155_vm10, %v158_v46, %v148_v40 }
 0x413   :  { %v167_v49 = vmul.f32 %v163_v43, %v159_v48 }
 0x415   :  { %168 = vadd.xlane.f32.xlu1 %v167_v49  ;;  %v173_v51 = vpop.xlane.xlu0 %172 }
 0x416   :  { %v174_v52 = vsel %vm166_vm11, %v173_v51, %v82_v42 }
 0x417   :  { %v186_v53 = vmul.f32 %v178_v50, %v174_v52 }
 0x419   :  { %187 = vadd.xlane.f32.xlu0 %v186_v53 }
 0x4a2   :  { %v169_v54 = vpop.xlane.xlu1 %168 }
 0x4a3   :  { %v170_v56 = vsel %vm166_vm11, %v169_v54, %v159_v48 }
 0x4a4   :  { %v182_v57 = vmul.f32 %v178_v50, %v170_v56 }
 0x4a6   :  { %183 = vadd.xlane.f32.xlu1 %v182_v57  ;;  %v188_v59 = vpop.xlane.xlu0 %187 }
 0x4a7   :  { %v189_v60 = vsel %vm181_vm12, %v188_v59, %v174_v52 }
 0x4a8   :  { %v201_v61 = vmul.f32 %v193_v58, %v189_v60 }
 0x4aa   :  { %202 = vadd.xlane.f32.xlu0 %v201_v61 }
 0x533   :  { %v184_v62 = vpop.xlane.xlu1 %183 }
 0x534   :  { %v185_v0 = vsel %vm181_vm12, %v184_v62, %v170_v56 }
 0x535   :  { %v197_v1 = vmul.f32 %v193_v58, %v185_v0 }
 0x537   :  { %198 = vadd.xlane.f32.xlu1 %v197_v1  ;;  %v203_v4 = vpop.xlane.xlu0 %202 }
 0x538   :  { %v204_v5 = vsel %vm196_vm13, %v203_v4, %v189_v60 }
 0x539   :  { %v216_v6 = vmul.f32 %v208_v2, %v204_v5 }
 0x53b   :  { %217 = vadd.xlane.f32.xlu0 %v216_v6 }
 0x5c4   :  { %v199_v7 = vpop.xlane.xlu1 %198 }
 0x5c5   :  { %v200_v8 = vsel %vm196_vm13, %v199_v7, %v185_v0 }
 0x5c6   :  { %v212_v9 = vmul.f32 %v208_v2, %v200_v8 }
 0x5c8   :  { %213 = vadd.xlane.f32.xlu1 %v212_v9  ;;  %v218_v10 = vpop.xlane.xlu0 %217 }
 0x5c9   :  { %v219_v11 = vsel %vm211_vm14, %v218_v10, %v204_v5 }
 0x5ca   :  { %222 = vst [vmem:[#allocation1 + $0x8] sm:$0xff] %v219_v11 }
 0x655   :  { %v214_v12 = vpop.xlane.xlu1 %213 }
 0x656   :  { %v215_v13 = vsel %vm211_vm14, %v214_v12, %v200_v8  }
 0x657   :  { %220 = vst [vmem:[#allocation1] sm:$0xff] %v215_v13 }
 0x658 LB:  { %s521_s17 = sphi %s519_s17, %s272_s17   ;;  %s517_s16 = sphi %s515_s16, %s273_s16  }
 0x65e   : > { %v270_v14 = vld [vmem:[%s521_s17] sm:$0xff]  ;;  %s272_s17 = scalar_lea.vmem %s521_s17, 8  }
 0x65f   : > { %271 = vst [vmem:[%s517_s16] sm:$0xff] %v270_v14  ;;  %s273_s16 = scalar_lea.vmem %s517_s16, 8   ;;  %p267_p2 = scmp.gt.s32.totalorder %s272_s17, [#allocation1 + $0x8] }
 0x661   :  { %269 = sbr.rel (!%p267_p2) target bundleno = 1624 (0x658), region = 114 }

// kernel: custom-call.46
= control target key start
LH: loop header
LB: loop body
LE: loop exit
PB: predicated region body
PF: predicated region fallthrough
CT: control target
= control target key end

     0   :  { %v484_v0 = vmov 0.0   ;;  %vm41_vm0 = vcmask 7168   ;;  %vm72_vm1 = vcmask 15368   ;;  %vm89_vm2 = vcmask 1047553   ;;  %s546_s0 = inlined_call_operand.vmem [shape: f32[12,12], index: 0, kind: input, shape index: {}]   ;;  %s547_s1 = inlined_call_operand.vmem [shape: f32[12,12], index: 1, kind: output, shape index: {}]  }
   0x1   :  { %38 = vst [vmem:[#allocation1] sm:$0xff] %v484_v0  ;;  %v498_v4 = vld [vmem:[%s546_s0] sm:$0xff]  ;;  %v504_v5 = vld [vmem:[%s546_s0 + $0x8] sm:$0xff]  ;;  %vm90_vm3 = vmand %vm72_vm1, %vm89_vm2  ;;  %vm107_vm4 = vcmask 23568   ;;  %vm124_vm5 = vcmask 1047554   ;;  %vm142_vm7 = vcmask 31768  }
   0x2   :  { %32 = vst [vmem:[#allocation0] sm:$0xff] %v498_v4  ;;  %34 = vst [vmem:[#allocation0 + $0x8] sm:$0xff] %v504_v5  ;;  %vm159_vm8 = vcmask 1047555   ;;  %vm177_vm10 = vcmask 39968   ;;  %vm194_vm11 = vcmask 1047556   ;;  %vm212_vm13 = vcmask 48168  }
   0x3   :  { %vm125_vm6 = vmand %vm107_vm4, %vm124_vm5  ;;  %vm229_vm14 = vcmask 1047557  }
   0x4   :  { %vm160_vm9 = vmand %vm142_vm7, %vm159_vm8 }
   0x5   :  { %vm195_vm12 = vmand %vm177_vm10, %vm194_vm11  ;;  %vm365_vm11 = vcmask 89168  }
   0x6   :  { %vm230_vm15 = vmand %vm212_vm13, %vm229_vm14 }
   0x8   :  { %v42_v1 = vld [vmem:[#allocation1] ss:$0 sm:$0xff] }
   0x9   :  { %v44_v2 = vmul.f32 %v42_v1, %v42_v1  ;;  %v63_v3 = vmul.f32 0.0, %v42_v1  ;;  %v43_v6 = vld [vmem:[#allocation0] ss:$0 sm:$0xff]  ;;  %v76_v22 = vld [vmem:[#allocation0 + $0x1] ss:$0 sm:$0xff] }
   0xa   :  { %v111_v40 = vld [vmem:[#allocation0 + $0x2] ss:$0 sm:$0xff]  ;;  %v146_v58 = vld [vmem:[#allocation0 + $0x3] ss:$0 sm:$0xff] }
   0xb   :  { %45 = vadd.xlane.f32.xlu0 %v44_v2  ;;  %64 = vadd.xlane.f32.xlu1 %v63_v3 }
   0xf   :  { %52 = vadd.xlane.f32.xlu0 %v63_v3 }
  0x98   :  { %v46_v7 = vpop.xlane.xlu0 %45  ;;  %v65_v13 = vpop.xlane.xlu1 %64 }
  0x99   :  { %v47_v8 = vsub.f32 %v43_v6, %v46_v7  ;;  %v66_v15 = vsub.f32 %v504_v5, %v65_v13 }
  0x9b   :  { %460 = vrsqrt.f32 %v47_v8 }
  0x9c   :  { %v53_v9 = vpop.xlane.xlu0 %52 }
  0x9d   :  { %v54_v10 = vsub.f32 %v498_v4, %v53_v9 }
  0xa5   :  { %v461_v11 = vpop.eup %460 }
  0xa6   :  { %v55_v12 = vmul.f32 %v461_v11, %v54_v10  ;;  %v67_v16 = vmul.f32 %v461_v11, %v66_v15 }
  0xa8   :  { %v56_v14 = vsel %vm41_vm0, %v55_v12, 0.0  ;;  %v68_v17 = vsel %vm41_vm0, %v67_v16, 0.0  ;;  %vm247_vm0 = vcmask 56368  }
  0xa9   :  { %58 = vst [vmem:[#allocation1] sm:$0xff] %v56_v14 }
  0xb0   :  { %v74_v18 = vld [vmem:[#allocation1 + $0x1] ss:$0 sm:$0xff] }
  0xb1   :  { %v84_v19 = vmul.f32 %v74_v18, %v56_v14  ;;  %v77_v20 = vmul.f32 %v74_v18, %v74_v18  ;;  %v98_v21 = vmul.f32 %v74_v18, %v68_v17 }
  0xb3   :  { %85 = vadd.xlane.f32.xlu0 %v84_v19  ;;  %78 = vadd.xlane.f32.xlu1 %v77_v20 }
  0xb7   :  { %99 = vadd.xlane.f32.xlu1 %v98_v21 }
 0x140   :  { %v79_v23 = vpop.xlane.xlu1 %78  ;;  %v86_v25 = vpop.xlane.xlu0 %85 }
 0x141   :  { %v80_v24 = vsub.f32 %v76_v22, %v79_v23  ;;  %v87_v26 = vsub.f32 %v498_v4, %v86_v25 }
 0x143   :  { %462 = vrsqrt.f32 %v80_v24 }
 0x144   :  { %v100_v31 = vpop.xlane.xlu1 %99 }
 0x145   :  { %v101_v32 = vsub.f32 %v504_v5, %v100_v31 }
 0x14d   :  { %v463_v27 = vpop.eup %462 }
 0x14e   :  { %v88_v28 = vmul.f32 %v463_v27, %v87_v26  ;;  %v102_v33 = vmul.f32 %v463_v27, %v101_v32  ;;  %v216_v32 = vld [vmem:[#allocation0 + $0x5] ss:$0 sm:$0xff] }
 0x150   :  { %v91_v29 = vsel %vm90_vm3, %v88_v28, 0.0  ;;  %v103_v34 = vsel %vm72_vm1, %v102_v33, 0.0  ;;  %vm264_vm1 = vcmask 1047558  }
 0x151   :  { %v92_v30 = vadd.f32 %v91_v29, %v56_v14  ;;  %v104_v38 = vadd.f32 %v103_v34, %v68_v17  ;;  %v181_v14 = vld [vmem:[#allocation0 + $0x4] ss:$0 sm:$0xff]  ;;  %vm265_vm3 = vmand %vm247_vm0, %vm264_vm1 }
 0x153   :  { %93 = vst [vmem:[#allocation1] sm:$0xff] %v92_v30 }
 0x15a   :  { %v109_v35 = vld [vmem:[#allocation1 + $0x2] ss:$0 sm:$0xff] }
 0x15b   :  { %v119_v36 = vmul.f32 %v109_v35, %v92_v30  ;;  %v112_v37 = vmul.f32 %v109_v35, %v109_v35  ;;  %v133_v39 = vmul.f32 %v109_v35, %v104_v38 }
 0x15d   :  { %120 = vadd.xlane.f32.xlu1 %v119_v36  ;;  %113 = vadd.xlane.f32.xlu0 %v112_v37 }
 0x161   :  { %134 = vadd.xlane.f32.xlu0 %v133_v39 }
 0x1ea   :  { %v114_v41 = vpop.xlane.xlu0 %113  ;;  %v121_v43 = vpop.xlane.xlu1 %120 }
 0x1eb   :  { %v115_v42 = vsub.f32 %v111_v40, %v114_v41  ;;  %v122_v44 = vsub.f32 %v498_v4, %v121_v43 }
 0x1ed   :  { %464 = vrsqrt.f32 %v115_v42 }
 0x1ee   :  { %v135_v49 = vpop.xlane.xlu0 %134 }
 0x1ef   :  { %v136_v50 = vsub.f32 %v504_v5, %v135_v49 }
 0x1f7   :  { %v465_v45 = vpop.eup %464 }
 0x1f8   :  { %v123_v46 = vmul.f32 %v465_v45, %v122_v44  ;;  %v137_v51 = vmul.f32 %v465_v45, %v136_v50  ;;  %v251_v50 = vld [vmem:[#allocation0 + $0x6] ss:$0 sm:$0xff] }
 0x1fa   :  { %v126_v47 = vsel %vm125_vm6, %v123_v46, 0.0  ;;  %v138_v52 = vsel %vm107_vm4, %v137_v51, 0.0  ;;  %vm282_vm4 = vcmask 64568   ;;  %vm317_vm6 = vcmask 72768  }
 0x1fb   :  { %v127_v48 = vadd.f32 %v126_v47, %v92_v30  ;;  %v139_v56 = vadd.f32 %v138_v52, %v104_v38 }
 0x1fd   :  { %128 = vst [vmem:[#allocation1] sm:$0xff] %v127_v48 }
 0x204   :  { %v144_v53 = vld [vmem:[#allocation1 + $0x3] ss:$0 sm:$0xff] }
 0x205   :  { %v154_v54 = vmul.f32 %v144_v53, %v127_v48  ;;  %v147_v55 = vmul.f32 %v144_v53, %v144_v53  ;;  %v168_v57 = vmul.f32 %v144_v53, %v139_v56 }
 0x207   :  { %155 = vadd.xlane.f32.xlu0 %v154_v54  ;;  %148 = vadd.xlane.f32.xlu1 %v147_v55 }
 0x20b   :  { %169 = vadd.xlane.f32.xlu1 %v168_v57 }
 0x294   :  { %v149_v59 = vpop.xlane.xlu1 %148  ;;  %v156_v61 = vpop.xlane.xlu0 %155 }
 0x295   :  { %v150_v60 = vsub.f32 %v146_v58, %v149_v59  ;;  %v157_v62 = vsub.f32 %v498_v4, %v156_v61 }
 0x297   :  { %466 = vrsqrt.f32 %v150_v60 }
 0x298   :  { %v170_v3 = vpop.xlane.xlu1 %169 }
 0x299   :  { %v171_v6 = vsub.f32 %v504_v5, %v170_v3  ;;  %v286_v3 = vld [vmem:[#allocation0 + $0x7] ss:$0 sm:$0xff] }
 0x2a1   :  { %v467_v63 = vpop.eup %466 }
 0x2a2   :  { %v158_v0 = vmul.f32 %v467_v63, %v157_v62  ;;  %v172_v7 = vmul.f32 %v467_v63, %v171_v6 }
 0x2a4   :  { %v161_v1 = vsel %vm160_vm9, %v158_v0, 0.0  ;;  %v173_v8 = vsel %vm142_vm7, %v172_v7, 0.0  ;;  %vm340_vm7 = vcmask 80968  }
 0x2a5   :  { %v162_v2 = vadd.f32 %v161_v1, %v127_v48  ;;  %v174_v12 = vadd.f32 %v173_v8, %v139_v56  ;;  %vm360_vm9 = vmand %vm340_vm7, %vm89_vm2 }
 0x2a7   :  { %163 = vst [vmem:[#allocation1] sm:$0xff] %v162_v2 }
 0x2ae   :  { %v179_v9 = vld [vmem:[#allocation1 + $0x4] ss:$0 sm:$0xff] }
 0x2af   :  { %v189_v10 = vmul.f32 %v179_v9, %v162_v2  ;;  %v182_v11 = vmul.f32 %v179_v9, %v179_v9  ;;  %v203_v13 = vmul.f32 %v179_v9, %v174_v12 }
 0x2b1   :  { %190 = vadd.xlane.f32.xlu1 %v189_v10  ;;  %183 = vadd.xlane.f32.xlu0 %v182_v11 }
 0x2b5   :  { %204 = vadd.xlane.f32.xlu0 %v203_v13 }
 0x33e   :  { %v184_v15 = vpop.xlane.xlu0 %183  ;;  %v191_v17 = vpop.xlane.xlu1 %190 }
 0x33f   :  { %v185_v16 = vsub.f32 %v181_v14, %v184_v15  ;;  %v192_v18 = vsub.f32 %v498_v4, %v191_v17  ;;  %v321_v17 = vld [vmem:[#allocation0 + $0x8] ss:$0 sm:$0xff] }
 0x341   :  { %468 = vrsqrt.f32 %v185_v16 }
 0x342   :  { %v205_v23 = vpop.xlane.xlu0 %204 }
 0x343   :  { %v206_v24 = vsub.f32 %v504_v5, %v205_v23 }
 0x34b   :  { %v469_v19 = vpop.eup %468 }
 0x34c   :  { %v193_v20 = vmul.f32 %v469_v19, %v192_v18  ;;  %v207_v25 = vmul.f32 %v469_v19, %v206_v24 }
 0x34e   :  { %v196_v21 = vsel %vm195_vm12, %v193_v20, 0.0  ;;  %v208_v26 = vsel %vm177_vm10, %v207_v25, 0.0  ;;  %vm299_vm10 = vcmask 1047559   ;;  %vm385_vm12 = vmand %vm365_vm11, %vm124_vm5 }
 0x34f   :  { %v197_v22 = vadd.f32 %v196_v21, %v162_v2  ;;  %v209_v30 = vadd.f32 %v208_v26, %v174_v12  ;;  %vm300_vm2 = vmand %vm282_vm4, %vm299_vm10 }
 0x351   :  { %198 = vst [vmem:[#allocation1] sm:$0xff] %v197_v22 }
 0x358   :  { %v214_v27 = vld [vmem:[#allocation1 + $0x5] ss:$0 sm:$0xff] }
 0x359   :  { %v224_v28 = vmul.f32 %v214_v27, %v197_v22  ;;  %v217_v29 = vmul.f32 %v214_v27, %v214_v27  ;;  %v238_v31 = vmul.f32 %v214_v27, %v209_v30 }
 0x35b   :  { %225 = vadd.xlane.f32.xlu0 %v224_v28  ;;  %218 = vadd.xlane.f32.xlu1 %v217_v29  ;;  %v344_v29 = vld [vmem:[#allocation0 + $0x9] ss:$0 sm:$0xff] }
 0x35f   :  { %239 = vadd.xlane.f32.xlu1 %v238_v31 }
 0x3e8   :  { %v219_v33 = vpop.xlane.xlu1 %218  ;;  %v226_v35 = vpop.xlane.xlu0 %225 }
 0x3e9   :  { %v220_v34 = vsub.f32 %v216_v32, %v219_v33  ;;  %v227_v36 = vsub.f32 %v498_v4, %v226_v35 }
 0x3eb   :  { %470 = vrsqrt.f32 %v220_v34 }
 0x3ec   :  { %v240_v41 = vpop.xlane.xlu1 %239 }
 0x3ed   :  { %v241_v42 = vsub.f32 %v504_v5, %v240_v41 }
 0x3f5   :  { %v471_v37 = vpop.eup %470 }
 0x3f6   :  { %v228_v38 = vmul.f32 %v471_v37, %v227_v36  ;;  %v242_v43 = vmul.f32 %v471_v37, %v241_v42  ;;  %v369_v42 = vld [vmem:[#allocation0 + $0xa] ss:$0 sm:$0xff] }
 0x3f8   :  { %v231_v39 = vsel %vm230_vm15, %v228_v38, 0.0  ;;  %v243_v44 = vsel %vm212_vm13, %v242_v43, 0.0  ;;  %vm390_vm13 = vcmask 97368  }
 0x3f9   :  { %v232_v40 = vadd.f32 %v231_v39, %v197_v22  ;;  %v244_v48 = vadd.f32 %v243_v44, %v209_v30  ;;  %vm410_vm5 = vmand %vm390_vm13, %vm159_vm8 }
 0x3fb   :  { %233 = vst [vmem:[#allocation1] sm:$0xff] %v232_v40 }
 0x402   :  { %v249_v45 = vld [vmem:[#allocation1 + $0x6] ss:$0 sm:$0xff] }
 0x403   :  { %v259_v46 = vmul.f32 %v249_v45, %v232_v40  ;;  %v252_v47 = vmul.f32 %v249_v45, %v249_v45  ;;  %v273_v49 = vmul.f32 %v249_v45, %v244_v48 }
 0x405   :  { %260 = vadd.xlane.f32.xlu1 %v259_v46  ;;  %253 = vadd.xlane.f32.xlu0 %v252_v47 }
 0x409   :  { %274 = vadd.xlane.f32.xlu0 %v273_v49 }
 0x492   :  { %v254_v51 = vpop.xlane.xlu0 %253  ;;  %v261_v53 = vpop.xlane.xlu1 %260 }
 0x493   :  { %v255_v52 = vsub.f32 %v251_v50, %v254_v51  ;;  %v262_v54 = vsub.f32 %v498_v4, %v261_v53 }
 0x495   :  { %472 = vrsqrt.f32 %v255_v52 }
 0x496   :  { %v275_v56 = vpop.xlane.xlu0 %274 }
 0x497   :  { %v276_v59 = vsub.f32 %v504_v5, %v275_v56 }
 0x49f   :  { %v473_v55 = vpop.eup %472 }
 0x4a0   :  { %v263_v57 = vmul.f32 %v473_v55, %v262_v54  ;;  %v277_v61 = vmul.f32 %v473_v55, %v276_v59 }
 0x4a2   :  { %v266_v58 = vsel %vm265_vm3, %v263_v57, 0.0  ;;  %v278_v62 = vsel %vm247_vm0, %v277_v61, 0.0 }
 0x4a3   :  { %v524_v60 = vadd.f32 %v266_v58, %v232_v40  ;;  %v279_v63 = vadd.f32 %v278_v62, %v244_v48  ;;  %v394_v58 = vld [vmem:[#allocation0 + $0xb] ss:$0 sm:$0xff] }
 0x4a5   :  { %268 = vst [vmem:[#allocation1] sm:$0xff] %v524_v60 }
 0x4ac   :  { %v284_v0 = vld [vmem:[#allocation1 + $0x7] ss:$0 sm:$0xff] }
 0x4ad   :  { %v308_v1 = vmul.f32 %v284_v0, %v279_v63  ;;  %v287_v2 = vmul.f32 %v284_v0, %v284_v0  ;;  %v294_v41 = vmul.f32 %v284_v0, %v524_v60 }
 0x4af   :  { %309 = vadd.xlane.f32.xlu0 %v308_v1  ;;  %288 = vadd.xlane.f32.xlu1 %v287_v2 }
 0x53c   :  { %v289_v6 = vpop.xlane.xlu1 %288  ;;  %v310_v8 = vpop.xlane.xlu0 %309 }
 0x53d   :  { %v290_v7 = vsub.f32 %v286_v3, %v289_v6  ;;  %v311_v9 = vsub.f32 %v504_v5, %v310_v8 }
 0x53f   :  { %474 = vrsqrt.f32 %v290_v7 }
 0x549   :  { %v475_v10 = vpop.eup %474 }
 0x54a   :  { %v312_v11 = vmul.f32 %v475_v10, %v311_v9 }
 0x54c   :  { %v313_v12 = vsel %vm282_vm4, %v312_v11, 0.0 }
 0x54d   :  { %v314_v13 = vadd.f32 %v313_v12, %v279_v63 }
 0x54f   :  { %316 = vst [vmem:[#allocation1 + $0x8] sm:$0xff] %v314_v13 }
 0x556   :  { %v319_v14 = vld [vmem:[#allocation1 + $0x8] ss:$0 sm:$0xff] }
 0x557   :  { %v331_v15 = vmul.f32 %v319_v14, %v314_v13  ;;  %v322_v16 = vmul.f32 %v319_v14, %v319_v14 }
 0x559   :  { %332 = vadd.xlane.f32.xlu0 %v331_v15  ;;  %323 = vadd.xlane.f32.xlu1 %v322_v16 }
 0x5e6   :  { %v324_v18 = vpop.xlane.xlu1 %323  ;;  %v333_v20 = vpop.xlane.xlu0 %332 }
 0x5e7   :  { %v325_v19 = vsub.f32 %v321_v17, %v324_v18  ;;  %v334_v21 = vsub.f32 %v504_v5, %v333_v20 }
 0x5e9   :  { %476 = vrsqrt.f32 %v325_v19 }
 0x5f3   :  { %v477_v22 = vpop.eup %476 }
 0x5f4   :  { %v335_v23 = vmul.f32 %v477_v22, %v334_v21 }
 0x5f6   :  { %v336_v24 = vsel %vm317_vm6, %v335_v23, 0.0 }
 0x5f7   :  { %v337_v25 = vadd.f32 %v336_v24, %v314_v13 }
 0x5f9   :  { %339 = vst [vmem:[#allocation1 + $0x8] sm:$0xff] %v337_v25 }
 0x600   :  { %v342_v26 = vld [vmem:[#allocation1 + $0x9] ss:$0 sm:$0xff] }
 0x601   :  { %v354_v27 = vmul.f32 %v342_v26, %v337_v25  ;;  %v345_v28 = vmul.f32 %v342_v26, %v342_v26 }
 0x603   :  { %355 = vadd.xlane.f32.xlu0 %v354_v27  ;;  %346 = vadd.xlane.f32.xlu1 %v345_v28 }
 0x690   :  { %v347_v30 = vpop.xlane.xlu1 %346  ;;  %v356_v32 = vpop.xlane.xlu0 %355 }
 0x691   :  { %v348_v31 = vsub.f32 %v344_v29, %v347_v30  ;;  %v357_v33 = vsub.f32 %v504_v5, %v356_v32 }
 0x693   :  { %478 = vrsqrt.f32 %v348_v31 }
 0x69d   :  { %v479_v34 = vpop.eup %478 }
 0x69e   :  { %v358_v35 = vmul.f32 %v479_v34, %v357_v33 }
 0x6a0   :  { %v361_v36 = vsel %vm360_vm9, %v358_v35, 0.0 }
 0x6a1   :  { %v362_v37 = vadd.f32 %v361_v36, %v337_v25 }
 0x6a3   :  { %364 = vst [vmem:[#allocation1 + $0x8] sm:$0xff] %v362_v37 }
 0x6aa   :  { %v367_v38 = vld [vmem:[#allocation1 + $0xa] ss:$0 sm:$0xff] }
 0x6ab   :  { %v379_v39 = vmul.f32 %v367_v38, %v362_v37  ;;  %v370_v40 = vmul.f32 %v367_v38, %v367_v38 }
 0x6ad   :  { %380 = vadd.xlane.f32.xlu0 %v379_v39  ;;  %371 = vadd.xlane.f32.xlu1 %v370_v40 }
 0x6b1   :  { %295 = vadd.xlane.f32.xlu0 %v294_v41 }
 0x73a   :  { %v381_v43 = vpop.xlane.xlu0 %380  ;;  %v372_v44 = vpop.xlane.xlu1 %371 }
 0x73b   :  { %v373_v45 = vsub.f32 %v369_v42, %v372_v44  ;;  %v382_v51 = vsub.f32 %v504_v5, %v381_v43 }
 0x73d   :  { %480 = vrsqrt.f32 %v373_v45 }
 0x73e   :  { %v296_v46 = vpop.xlane.xlu0 %295 }
 0x73f   :  { %v297_v47 = vsub.f32 %v498_v4, %v296_v46 }
 0x741   :  { %v298_v48 = vmul.f32 %v475_v10, %v297_v47 }
 0x743   :  { %v301_v49 = vsel %vm300_vm2, %v298_v48, 0.0 }
 0x744   :  { %v302_v50 = vadd.f32 %v301_v49, %v524_v60 }
 0x746   :  { %303 = vst [vmem:[#allocation1] sm:$0xff] %v302_v50  ;;  %445 = vst [vmem:[%s547_s1] sm:$0xff] %v302_v50 }
 0x747   :  { %v481_v52 = vpop.eup %480 }
 0x748   :  { %v383_v53 = vmul.f32 %v481_v52, %v382_v51 }
 0x74a   :  { %v386_v54 = vsel %vm385_vm12, %v383_v53, 0.0 }
 0x74b   :  { %v387_v4 = vadd.f32 %v386_v54, %v362_v37 }
 0x74d   :  { %389 = vst [vmem:[#allocation1 + $0x8] sm:$0xff] %v387_v4 }
 0x754   :  { %v392_v55 = vld [vmem:[#allocation1 + $0xb] ss:$0 sm:$0xff] }
 0x755   :  { %v395_v56 = vmul.f32 %v392_v55, %v392_v55  ;;  %v404_v57 = vmul.f32 %v392_v55, %v387_v4 }
 0x757   :  { %396 = vadd.xlane.f32.xlu1 %v395_v56 }
 0x75b   :  { %405 = vadd.xlane.f32.xlu1 %v404_v57 }
 0x7e4   :  { %v397_v59 = vpop.xlane.xlu1 %396 }
 0x7e5   :  { %v398_v60 = vsub.f32 %v394_v58, %v397_v59 }
 0x7e7   :  { %482 = vrsqrt.f32 %v398_v60 }
 0x7e8   :  { %v406_v61 = vpop.xlane.xlu1 %405 }
 0x7e9   :  { %v407_v62 = vsub.f32 %v504_v5, %v406_v61 }
 0x7f1   :  { %v483_v63 = vpop.eup %482 }
 0x7f2   :  { %v408_v0 = vmul.f32 %v483_v63, %v407_v62 }
 0x7f4   :  { %v411_v1 = vsel %vm410_vm5, %v408_v0, 0.0 }
 0x7f5   :  { %v412_v2 = vadd.f32 %v411_v1, %v387_v4 }
 0x7f7   :  { %414 = vst [vmem:[#allocation1 + $0x8] sm:$0xff] %v412_v2  ;;  %447 = vst [vmem:[%s547_s1 + $0x8] sm:$0xff] %v412_v2 }

// kernel: custom-call.47
= control target key start
LH: loop header
LB: loop body
LE: loop exit
PB: predicated region body
PF: predicated region fallthrough
CT: control target
= control target key end

     0   :  { %v38_v0 = vlaneseq  ;;  %v276_v9 = vmov -1.0   ;;  %v277_v53 = vmov 0.0   ;;  %s337_s0 = inlined_call_operand.vmem [shape: f32[1,12,12], index: 0, kind: input, shape index: {}]   ;;  %s338_s1 = inlined_call_operand.vmem [shape: f32[1,12,12], index: 1, kind: output, shape index: {}]  }
   0x1   :  { %v31_v1 = vld [vmem:[%s337_s0] sm:$0xff]  ;;  %v33_v36 = vld [vmem:[%s337_s0 + $0x8] sm:$0xff] }
   0x2   :  { %v291_v2 = vand.u32 127, %v38_v0  ;;  %v42_v3 = vshrl.u32 %v38_v0, 7 }
   0x4   :  { %vm44_vm0 = vcmp.eq.s32.totalorder %v42_v3, %v291_v2  ;;  %vm40_vm1 = vcmp.lt.s32.totalorder %v291_v2, 12  ;;  %vm49_vm2 = vcmp.ge.s32.totalorder %v42_v3, %v291_v2  ;;  %vm79_vm4 = vcmp.eq.s32.totalorder %v291_v2, 0 }
   0x5   :  { %v46_v4 = vsel %vm44_vm0, %v31_v1, 0.0  ;;  %vm50_vm3 = vmand %vm49_vm2, %vm40_vm1  ;;  %vm76_vm5 = vcmp.eq.s32.totalorder %v291_v2, %v42_v3  ;;  %v80_v10 = vsel %vm79_vm4, 1.0, %v276_v9  ;;  %vm94_vm6 = vcmp.eq.s32.totalorder %v291_v2, 1 }
   0x6   :  { %47 = vadd.xlane.f32.xlu0 %v46_v4  ;;  %v51_v6 = vsel %vm50_vm3, %v31_v1, 0.0  ;;  %v81_v11 = vsel %vm76_vm5, %v80_v10, 0.0  ;;  %vm104_vm7 = vcmp.eq.s32.totalorder %v291_v2, 2  ;;  %vm114_vm8 = vcmp.eq.s32.totalorder %v291_v2, 3 }
   0x7   :  { %vm124_vm9 = vcmp.eq.s32.totalorder %v291_v2, 4  ;;  %v59_v31 = vadd.s32 8, %v42_v3  ;;  %vm134_vm11 = vcmp.eq.s32.totalorder %v291_v2, 5  ;;  %vm144_vm14 = vcmp.eq.s32.totalorder %v291_v2, 6 }
   0x8   :  { %vm154_vm0 = vcmp.eq.s32.totalorder %v291_v2, 7  ;;  %vm178_vm2 = vcmp.eq.s32.totalorder %v291_v2, 9  ;;  %vm192_vm3 = vcmp.eq.s32.totalorder %v291_v2, 10  ;;  %vm206_vm4 = vcmp.eq.s32.totalorder %v291_v2, 11 }
   0x9   :  { %vm60_vm10 = vcmp.eq.s32.totalorder %v59_v31, %v291_v2  ;;  %vm65_vm12 = vcmp.ge.s32.totalorder %v59_v31, %v291_v2  ;;  %vm87_vm15 = vcmp.eq.s32.totalorder %v291_v2, %v59_v31 }
   0xa   :  { %v62_v37 = vsel %vm60_vm10, %v33_v36, 0.0  ;;  %vm66_vm13 = vmand %vm65_vm12, %vm40_vm1  ;;  %v88_v54 = vsel %vm87_vm15, -1.0, %v277_v53  ;;  %vm164_vm1 = vcmp.eq.s32.totalorder %v291_v2, 8 }
   0xb   :  { %v67_v44 = vsel %vm66_vm13, %v33_v36, 0.0 }
  0x93   :  { %v294_v5 = vpop.xlane.xlu0 %47 }
  0x94   :  { %272 = vrcp.f32 %v294_v5 }
  0x9e   :  { %v301_v7 = vpop.eup %272 }
  0x9f   :  { %v53_v8 = vmul.f32 %v301_v7, %v51_v6 }
  0xa1   :  { %54 = vst [vmem:[#allocation2] sm:$0xff] %v53_v8 }
  0xa8   :  { %v90_v12 = vld [vmem:[#allocation2 + $0x1] ss:$0 sm:$0xff]  ;;  %v100_v15 = vld [vmem:[#allocation2 + $0x2] ss:$0 sm:$0xff]  ;;  %v110_v20 = vld [vmem:[#allocation2 + $0x3] ss:$0 sm:$0xff] }
  0xa9   :  { %v91_v13 = vxor.u32 2147483648, %v90_v12  ;;  %v101_v17 = vxor.u32 2147483648, %v100_v15  ;;  %v111_v22 = vxor.u32 2147483648, %v110_v20  ;;  %v120_v25 = vld [vmem:[#allocation2 + $0x4] ss:$0 sm:$0xff] }
  0xaa   :  { %v121_v27 = vxor.u32 2147483648, %v120_v25  ;;  %v130_v30 = vld [vmem:[#allocation2 + $0x5] ss:$0 sm:$0xff]  ;;  %v140_v38 = vld [vmem:[#allocation2 + $0x6] ss:$0 sm:$0xff] }
  0xab   :  { %v95_v14 = vmul.f32 %v91_v13, %v81_v11  ;;  %v131_v33 = vxor.u32 2147483648, %v130_v30  ;;  %v141_v40 = vxor.u32 2147483648, %v140_v38  ;;  %v150_v47 = vld [vmem:[#allocation2 + $0x7] ss:$0 sm:$0xff] }
  0xac   :  { %v151_v50 = vxor.u32 2147483648, %v150_v47 }
  0xad   :  { %96 = vadd.xlane.f32.xlu0 %v95_v14 }
 0x13a   :  { %v97_v16 = vpop.xlane.xlu0 %96 }
 0x13b   :  { %v98_v18 = vsel %vm94_vm6, %v97_v16, %v81_v11  ;;  %vm217_vm6 = vweird.f32 %v294_v5 }
 0x13c   :  { %v105_v19 = vmul.f32 %v101_v17, %v98_v18 }
 0x13e   :  { %106 = vadd.xlane.f32.xlu1 %v105_v19 }
 0x1cb   :  { %v107_v21 = vpop.xlane.xlu1 %106 }
 0x1cc   :  { %v108_v23 = vsel %vm104_vm7, %v107_v21, %v98_v18 }
 0x1cd   :  { %v115_v24 = vmul.f32 %v111_v22, %v108_v23 }
 0x1cf   :  { %116 = vadd.xlane.f32.xlu1 %v115_v24 }
 0x25c   :  { %v117_v26 = vpop.xlane.xlu1 %116 }
 0x25d   :  { %v118_v28 = vsel %vm114_vm8, %v117_v26, %v108_v23 }
 0x25e   :  { %v125_v29 = vmul.f32 %v121_v27, %v118_v28 }
 0x260   :  { %126 = vadd.xlane.f32.xlu0 %v125_v29 }
 0x2ed   :  { %v127_v32 = vpop.xlane.xlu0 %126 }
 0x2ee   :  { %v128_v34 = vsel %vm124_vm9, %v127_v32, %v118_v28 }
 0x2ef   :  { %v135_v35 = vmul.f32 %v131_v33, %v128_v34 }
 0x2f1   :  { %136 = vadd.xlane.f32.xlu1 %v135_v35 }
 0x2f5   :  { %63 = vadd.xlane.f32.xlu1 %v62_v37 }
 0x37e   :  { %v137_v39 = vpop.xlane.xlu1 %136 }
 0x37f   :  { %v138_v41 = vsel %vm134_vm11, %v137_v39, %v128_v34 }
 0x380   :  { %v145_v42 = vmul.f32 %v141_v40, %v138_v41 }
 0x382   :  { %146 = vadd.xlane.f32.xlu0 %v145_v42  ;;  %v315_v43 = vpop.xlane.xlu1 %63 }
 0x383   :  { %274 = vrcp.f32 %v315_v43  ;;  %vm222_vm5 = vweird.f32 %v315_v43 }
 0x38d   :  { %v275_v45 = vpop.eup %274 }
 0x38e   :  { %v69_v46 = vmul.f32 %v275_v45, %v67_v44 }
 0x390   :  { %70 = vst [vmem:[#allocation2 + $0x8] sm:$0xff] %v69_v46 }
 0x397   :  { %v160_v48 = vld [vmem:[#allocation2 + $0x8] ss:$0 sm:$0xff]  ;;  %v174_v59 = vld [vmem:[#allocation2 + $0x9] ss:$0 sm:$0xff]  ;;  %v188_v4 = vld [vmem:[#allocation2 + $0xa] ss:$0 sm:$0xff] }
 0x398   :  { %v161_v51 = vxor.u32 2147483648, %v160_v48  ;;  %v175_v62 = vxor.u32 2147483648, %v174_v59  ;;  %v189_v9 = vxor.u32 2147483648, %v188_v4  ;;  %v202_v14 = vld [vmem:[#allocation2 + $0xb] ss:$0 sm:$0xff] }
 0x399   :  { %v203_v17 = vxor.u32 2147483648, %v202_v14 }
 0x39a   :  { %v169_v56 = vmul.f32 %v161_v51, %v88_v54 }
 0x40f   :  { %v147_v49 = vpop.xlane.xlu0 %146 }
 0x410   :  { %v148_v52 = vsel %vm144_vm14, %v147_v49, %v138_v41 }
 0x411   :  { %v155_v55 = vmul.f32 %v151_v50, %v148_v52 }
 0x413   :  { %156 = vadd.xlane.f32.xlu0 %v155_v55 }
 0x417   :  { %170 = vadd.xlane.f32.xlu0 %v169_v56 }
 0x4a0   :  { %v157_v57 = vpop.xlane.xlu0 %156 }
 0x4a1   :  { %v158_v58 = vsel %vm154_vm0, %v157_v57, %v148_v52 }
 0x4a2   :  { %v165_v60 = vmul.f32 %v161_v51, %v158_v58 }
 0x4a4   :  { %v171_v61 = vpop.xlane.xlu0 %170  ;;  %166 = vadd.xlane.f32.xlu1 %v165_v60 }
 0x4a5   :  { %v172_v63 = vsel %vm164_vm1, %v171_v61, %v88_v54 }
 0x4a6   :  { %v183_v0 = vmul.f32 %v175_v62, %v172_v63 }
 0x4a8   :  { %184 = vadd.xlane.f32.xlu0 %v183_v0 }
 0x531   :  { %v167_v1 = vpop.xlane.xlu1 %166 }
 0x532   :  { %v168_v3 = vsel %vm164_vm1, %v167_v1, %v158_v58 }
 0x533   :  { %v179_v6 = vmul.f32 %v175_v62, %v168_v3 }
 0x535   :  { %v185_v8 = vpop.xlane.xlu0 %184  ;;  %180 = vadd.xlane.f32.xlu1 %v179_v6 }
 0x536   :  { %v186_v10 = vsel %vm178_vm2, %v185_v8, %v172_v63 }
 0x537   :  { %v197_v11 = vmul.f32 %v189_v9, %v186_v10 }
 0x539   :  { %198 = vadd.xlane.f32.xlu0 %v197_v11 }
 0x5c2   :  { %v181_v12 = vpop.xlane.xlu1 %180 }
 0x5c3   :  { %v182_v13 = vsel %vm178_vm2, %v181_v12, %v168_v3 }
 0x5c4   :  { %v193_v15 = vmul.f32 %v189_v9, %v182_v13 }
 0x5c6   :  { %v199_v16 = vpop.xlane.xlu0 %198  ;;  %194 = vadd.xlane.f32.xlu1 %v193_v15 }
 0x5c7   :  { %v200_v18 = vsel %vm192_vm3, %v199_v16, %v186_v10 }
 0x5c8   :  { %v211_v19 = vmul.f32 %v203_v17, %v200_v18 }
 0x5ca   :  { %212 = vadd.xlane.f32.xlu0 %v211_v19 }
 0x653   :  { %v195_v20 = vpop.xlane.xlu1 %194 }
 0x654   :  { %v196_v21 = vsel %vm192_vm3, %v195_v20, %v182_v13 }
 0x655   :  { %v207_v22 = vmul.f32 %v203_v17, %v196_v21 }
 0x657   :  { %v213_v23 = vpop.xlane.xlu0 %212  ;;  %208 = vadd.xlane.f32.xlu1 %v207_v22 }
 0x658   :  { %v214_v24 = vsel %vm206_vm4, %v213_v23, %v200_v18 }
 0x659   :  { %v221_v25 = vmul.f32 %v275_v45, %v214_v24 }
 0x65b   :  { %v223_v26 = vsel %vm222_vm5, %v214_v24, %v221_v25 }
 0x65c   :  { %258 = vst [vmem:[%s338_s1 + $0x8] sm:$0xff] %v223_v26 }
 0x6e4   :  { %v209_v27 = vpop.xlane.xlu1 %208 }
 0x6e5   :  { %v210_v28 = vsel %vm206_vm4, %v209_v27, %v196_v21 }
 0x6e6   :  { %v216_v29 = vmul.f32 %v301_v7, %v210_v28 }
 0x6e8   :  { %v218_v30 = vsel %vm217_vm6, %v210_v28, %v216_v29 }
 0x6e9   :  { %256 = vst [vmem:[%s338_s1] sm:$0xff] %v218_v30 }

// kernel: custom-call.16
= control target key start
LH: loop header
LB: loop body
LE: loop exit
PB: predicated region body
PF: predicated region fallthrough
CT: control target
= control target key end

     0   :  { %s2375_s30 = smov [#allocation0]   ;;  %s2742_s0 = inlined_call_operand.vmem [shape: f32[6,6], index: 0, kind: input, shape index: {}]   ;;  %s2743_s1 = inlined_call_operand.vmem [shape: f32[6,6], index: 1, kind: input, shape index: {}]   ;;  %s2744_s2 = inlined_call_operand.vmem [shape: f32[6,6], index: 2, kind: input, shape index: {}]   ;;  %s2745_s3 = inlined_call_operand.vmem [shape: f32[6,6], index: 3, kind: input, shape index: {}]   ;;  %s2746_s4 = inlined_call_operand.vmem [shape: f32[6], index: 4, kind: output, shape index: {0}]   ;;  %s2747_s5 = inlined_call_operand.vmem [shape: f32[6], index: 5, kind: output, shape index: {1}]   ;;  %s2748_s6 = inlined_call_operand.vmem [shape: f32[6,6], index: 6, kind: output, shape index: {2}]   ;;  %s2749_s7 = inlined_call_operand.vmem [shape: f32[6,6], index: 7, kind: output, shape index: {3}]   ;;  %s2750_s8 = inlined_call_operand.vmem [shape: f32[6,6], index: 8, kind: output, shape index: {4}]   ;;  %s2751_s9 = inlined_call_operand.vmem [shape: f32[6,6], index: 9, kind: output, shape index: {5}]  }
   0x1   :  { %s2379_s12 = smov %s2742_s0  }
   0x2 LB: > { %v58_v0 = vld [vmem:[%s2381_s12] sm:$0xff]  ;;  %s60_s12 = scalar_lea.vmem %s2381_s12, 8   ;;  %s2381_s12 = sphi %s2379_s12, %s60_s12   ;;  %s2377_s30 = sphi %s2375_s30, %s61_s30  }
   0x3   : > { %59 = vst [vmem:[%s2377_s30] sm:$0xff] %v58_v0  ;;  %s61_s30 = scalar_lea.vmem %s2377_s30, 8   ;;  %p55_p0 = scmp.gt.s32.totalorder %s60_s12, %s2742_s0 }
   0x4   :  { %s2383_s15 = smov (%p55_p0), [#allocation1]   ;;  %s2387_s18 = smov (%p55_p0), %s2743_s1  }
   0x5   :  { %57 = sbr.rel (!%p55_p0) target bundleno = 2 (0x2), region = 358 }
   0xc LB: > { %v120_v1 = vld [vmem:[%s2389_s18] sm:$0xff]  ;;  %s122_s18 = scalar_lea.vmem %s2389_s18, 8   ;;  %s2389_s18 = sphi %s2387_s18, %s122_s18   ;;  %s2385_s15 = sphi %s2383_s15, %s123_s15  }
   0xd   : > { %121 = vst [vmem:[%s2385_s15] sm:$0xff] %v120_v1  ;;  %s123_s15 = scalar_lea.vmem %s2385_s15, 8   ;;  %p117_p1 = scmp.gt.s32.totalorder %s122_s18, %s2743_s1 }
   0xe   :  { %s2391_s0 = smov (%p117_p1), [#allocation2]   ;;  %s2395_s23 = smov (%p117_p1), %s2744_s2  }
   0xf   :  { %119 = sbr.rel (!%p117_p1) target bundleno = 12 (0xc), region = 380 }
  0x16 LB: > { %v182_v2 = vld [vmem:[%s2397_s23] sm:$0xff]  ;;  %s184_s23 = scalar_lea.vmem %s2397_s23, 8   ;;  %s2397_s23 = sphi %s2395_s23, %s184_s23   ;;  %s2393_s0 = sphi %s2391_s0, %s185_s0  }
  0x17   : > { %183 = vst [vmem:[%s2393_s0] sm:$0xff] %v182_v2  ;;  %s185_s0 = scalar_lea.vmem %s2393_s0, 8   ;;  %p179_p2 = scmp.gt.s32.totalorder %s184_s23, %s2744_s2 }
  0x18   :  { %s2399_s1 = smov (%p179_p2), [#allocation3]   ;;  %s2403_s28 = smov (%p179_p2), %s2745_s3  }
  0x19   :  { %181 = sbr.rel (!%p179_p2) target bundleno = 22 (0x16), region = 402 }
  0x20 LB: > { %v244_v3 = vld [vmem:[%s2405_s28] sm:$0xff]  ;;  %s246_s28 = scalar_lea.vmem %s2405_s28, 8   ;;  %s2405_s28 = sphi %s2403_s28, %s246_s28   ;;  %s2401_s1 = sphi %s2399_s1, %s247_s1  }
  0x21   : > { %245 = vst [vmem:[%s2401_s1] sm:$0xff] %v244_v3  ;;  %s247_s1 = scalar_lea.vmem %s2401_s1, 8   ;;  %p241_p3 = scmp.gt.s32.totalorder %s246_s28, %s2745_s3 }
  0x22   :  { %s259_s2 = smov (%p241_p3), [#allocation12]  ;;  %v260_v4 = vld [vmem:[#allocation0] sm:$0xff] (%p241_p3)  ;;  %s262_s10 = smov (%p241_p3), [#allocation13]  ;;  %v263_v5 = vld [vmem:[#allocation1] sm:$0xff] (%p241_p3)  ;;  %v266_v6 = vld [vmem:[#allocation2] sm:$0xff] (%p241_p3)  ;;  %v276_v7 = vlaneseq (%p241_p3)  ;;  %v2447_v9 = vmov (%p241_p3), 0.0  }
  0x23   :  { %243 = sbr.rel (!%p241_p3) target bundleno = 32 (0x20), region = 424  ;;  %261 = vst [vmem:[%s259_s2] sm:$0xff] (%p241_p3), %v260_v4  ;;  %264 = vst [vmem:[%s262_s10] sm:$0xff] (%p241_p3), %v263_v5  ;;  %s265_s11 = smov (%p241_p3), [#allocation14] }
  0x24   :  { %s268_s12 = smov (%p241_p3), [#allocation15]  ;;  %271 = vst [vmem:[#allocation8] sm:$0xff] (%p241_p3), %v2447_v9  ;;  %272 = vst [vmem:[#allocation9] sm:$0xff] (%p241_p3), %v2447_v9  ;;  %v2524_v10 = vand.u32 (%p241_p3), 127, %v276_v7  ;;  %v2526_v11 = vshrl.u32 (%p241_p3), %v276_v7, 7  ;;  %s275_s3 = smov (%p241_p3), [#allocation8] }
  0x25   :  { %273 = vst [vmem:[#allocation10] sm:$0xff] (%p241_p3), %v2447_v9  ;;  %274 = vst [vmem:[#allocation11] sm:$0xff] (%p241_p3), %v2447_v9  ;;  %s288_s13 = smov (%p241_p3), [#allocation11]  ;;  %s1401_s14 = smov (%p241_p3), [#allocation12] }
  0x26   :  { %267 = vst [vmem:[%s265_s11] sm:$0xff] (%p241_p3), %v266_v6  ;;  %v278_v10 = vmov (%p241_p3), %v2524_v10  ;;  %v281_v11 = vmov (%p241_p3), %v2526_v11  ;;  %vm1405_vm2 = vcmp.lt.s32.totalorder (%p241_p3), %v2524_v10, 6  ;;  %s1418_s15 = smov (%p241_p3), [#allocation13]  ;;  %s1435_s16 = smov (%p241_p3), [#allocation14] }
  0x27   :  { %v291_v10 = vmov (%p241_p3), %v2524_v10  ;;  %v294_v11 = vmov (%p241_p3), %v2526_v11  ;;  %vm285_vm0 = vcmp.eq.s32.totalorder (%p241_p3), %v281_v11, %v278_v10  ;;  %s1452_s17 = smov (%p241_p3), [#allocation15] }
  0x28   :  { %v269_v8 = vld [vmem:[#allocation3] sm:$0xff] (%p241_p3)  ;;  %vm298_vm1 = vcmp.eq.s32.totalorder (%p241_p3), %v294_v11, %v291_v10  ;;  %v1397_v10 = vmov (%p241_p3), %v2524_v10  ;;  %v1400_v11 = vmov (%p241_p3), %v2526_v11 }
  0x29   :  { %270 = vst [vmem:[%s268_s12] sm:$0xff] (%p241_p3), %v269_v8  ;;  %vm1410_vm3 = vcmp.eq.s32.totalorder (%p241_p3), %v1400_v11, %v1397_v10  ;;  %v1448_v10 = vmov (%p241_p3), %v2524_v10  ;;  %v1417_v11 = vmov (%p241_p3), %v2526_v11 }
  0x2a   :  { %v1407_v16 = vld [vmem:[%s1401_s14] sm:$0x3f]  ;;  %v1414_v10 = vmov %v2524_v10  ;;  %v1451_v11 = vmov %v2526_v11 }
  0x2b   :  { %v282_v12 = vld [vmem:[%s275_s3] sm:$0x3f]  ;;  %v1408_v18 = vsel %vm1405_vm2, %v1407_v16, 0.0  ;;  %v1431_v10 = vmov %v2524_v10  ;;  %v1434_v11 = vmov %v2526_v11  ;;  %vm1461_vm4 = vcmp.eq.s32.totalorder %v1451_v11, %v1448_v10 }
  0x2c   :  { %v295_v13 = vld [vmem:[%s288_s13] sm:$0x3f]  ;;  %v286_v14 = vsel %vm285_vm0, 1.0, %v282_v12  ;;  %v1409_v22 = vmul.f32 %v1408_v18, %v1408_v18 }
  0x2d   :  { %v299_v15 = vsel %vm298_vm1, 1.0, %v295_v13  ;;  %287 = vst [vmem:[%s275_s3] sm:$0x3f] %v286_v14  ;;  %v1424_v17 = vld [vmem:[%s1418_s15] sm:$0x3f] }
  0x2e   :  { %300 = vst [vmem:[%s288_s13] sm:$0x3f] %v299_v15  ;;  %v1425_v19 = vsel %vm1405_vm2, %v1424_v17, 0.0  ;;  %v1441_v20 = vld [vmem:[%s1435_s16] sm:$0x3f]  ;;  %v1411_v29 = vsel %vm1410_vm3, 0.0, %v1409_v22 }
  0x2f   :  { %v1426_v23 = vmul.f32 %v1425_v19, %v1425_v19  ;;  %v1442_v24 = vsel %vm1405_vm2, %v1441_v20, 0.0 }
  0x30   :  { %v1458_v21 = vld [vmem:[%s1452_s17] sm:$0x3f]  ;;  %v1443_v26 = vmul.f32 %v1442_v24, %v1442_v24 }
  0x31   :  { %v1459_v25 = vsel %vm1405_vm2, %v1458_v21, 0.0  ;;  %v1428_v27 = vadd.f32 %v1426_v23, %v1409_v22  ;;  %v1427_v30 = vadd.f32 %v1426_v23, %v1411_v29 }
  0x32   :  { %v1460_v28 = vmul.f32 %v1459_v25, %v1459_v25 }
  0x33   :  { %v1445_v31 = vadd.f32 %v1443_v26, %v1428_v27  ;;  %v1444_v32 = vadd.f32 %v1443_v26, %v1427_v30 }
  0x34   :  { %v1462_v33 = vsel %vm1461_vm4, 0.0, %v1460_v28 }
  0x35   :  { %v1464_v34 = vadd.f32 %v1460_v28, %v1445_v31  ;;  %v1463_v35 = vadd.f32 %v1462_v33, %v1444_v32 }
  0x37   :  { %1465 = vadd.xlane.f32.xlu0 %v1464_v34 }
  0x3b   :  { %1473 = vadd.xlane.f32.xlu0 %v1463_v35 }
  0xc4   :  { %v1466_v36 = vpop.xlane.xlu0 %1465 }
  0xc5   :  { %v1467_v37 = vrot.slane %v1466_v36, 4 }
  0xc7   :  { %v1468_v38 = vadd.f32 %v1467_v37, %v1466_v36 }
  0xc8   :  { %v1474_v39 = vpop.xlane.xlu0 %1473 }
  0xc9   :  { %v1469_v40 = vrot.slane %v1468_v38, 2  ;;  %v1475_v41 = vrot.slane %v1474_v39, 4 }
  0xcb   :  { %v1476_v42 = vadd.f32 %v1475_v41, %v1474_v39  ;;  %v1470_v43 = vadd.f32 %v1469_v40, %v1468_v38 }
  0xcd   :  { %v1477_v44 = vrot.slane %v1476_v42, 2  ;;  %v1471_v46 = vrot.slane %v1470_v43, 1 }
  0xcf   :  { %v1478_v45 = vadd.f32 %v1477_v44, %v1476_v42  ;;  %v1472_v49 = vadd.f32 %v1471_v46, %v1470_v43 }
  0xd1   :  { %v1479_v47 = vrot.slane %v1478_v45, 1 }
  0xd3   :  { %v1480_v48 = vadd.f32 %v1479_v47, %v1478_v45 }
  0xd5   :  { %1656 = vpush %v1480_v48 }
  0xd6   :  { %1658 = vpush %v1472_v49 }
 0x106   :  { %s1657_s18 = spop %1656 }
 0x107   :  { %s1659_s19 = spop %1658 }
 0x108   :  { %s1483_s20 = smul.f32 1e-10, %s1659_s19 }
 0x10a   :  { %p1484_p4 = scmp.le.f32.partialorder %s1657_s18, %s1483_s20 }
 0x10b   :  { %s2550_s0 = smov (!%p1484_p4), 0  }
 0x10c   :  { %1487 = sbr.rel (%p1484_p4) target bundleno = 950 (0x3b6), region = 440 }
 0x113 LB: > { %s2555_s21 = smov 0   ;;  %s2409_s0 = sphi %s2550_s0, %s2752_s0  }
 0x114 LB: >> { %s405_s22 = smov [#allocation12]  ;;  %v409_v10 = vmov %v2524_v10  ;;  %v412_v11 = vmov %v2526_v11  ;;  %s425_s23 = smov [#allocation13]  ;;  %vm728_vm14 = vcmp.eq.s32.totalorder %v2526_v11, 0  ;;  %vm740_vm15 = vcmp.eq.s32.totalorder %v2526_v11, 5  ;;  %s2413_s21 = sphi %s2555_s21, %s404_s21  }
 0x115   : >> { %v429_v10 = vmov %v2524_v10  ;;  %v432_v11 = vmov %v2526_v11  ;;  %v413_v50 = vld [vmem:[%s405_s22] sm:$0x3f]  ;;  %vm416_vm5 = vcmp.eq.s32.totalorder %v412_v11, %v409_v10  ;;  %s445_s24 = smov [#allocation15]  ;;  %s406_s25 = smov [#allocation16] }
 0x116   : >> { %vm436_vm6 = vcmp.eq.s32.totalorder %v432_v11, %v429_v10  ;;  %v449_v10 = vmov %v2524_v10  ;;  %v452_v11 = vmov %v2526_v11  ;;  %v417_v51 = vsel %vm416_vm5, %v413_v50, 0.0  ;;  %v433_v52 = vld [vmem:[%s425_s23] sm:$0x3f]  ;;  %s426_s1 = smov [#allocation17]  ;;  %s446_s26 = smov [#allocation18] }
 0x117   : >> { %vm456_vm7 = vcmp.eq.s32.totalorder %v452_v11, %v449_v10  ;;  %v418_v53 = vrot.slane %v417_v51, 4  ;;  %v437_v54 = vsel %vm436_vm6, %v433_v52, 0.0  ;;  %v453_v55 = vld [vmem:[%s445_s24] sm:$0x3f]  ;;  %s469_s27 = smov [#allocation17]  ;;  %s467_s28 = smov [#allocation16]  ;;  %v518_v10 = vmov %v2524_v10 }
 0x118   : >> { %v438_v56 = vrot.slane %v437_v54, 4  ;;  %v457_v57 = vsel %vm456_vm7, %v453_v55, 0.0  ;;  %s471_s29 = smov [#allocation18]  ;;  %s506_s30 = smov [#allocation19]  ;;  %v521_v11 = vmov %v2526_v11  ;;  %v533_v10 = vmov %v2524_v10 }
 0x119   : >> { %v419_v58 = vadd.f32 %v418_v53, %v417_v51  ;;  %v458_v59 = vrot.slane %v457_v57, 4  ;;  %s508_s2 = smov [#allocation20]  ;;  %s465_s10 = smov [#allocation21]  ;;  %v536_v11 = vmov %v2526_v11  ;;  %vm523_vm12 = vcmp.eq.s32.totalorder %v521_v11, %v518_v10 }
 0x11a   : >> { %v439_v60 = vadd.f32 %v438_v56, %v437_v54  ;;  %s466_s11 = smov [#allocation22]  ;;  %s510_s10 = smov %s465_s10  ;;  %vm538_vm13 = vcmp.eq.s32.totalorder %v536_v11, %v533_v10  ;;  %v631_v10 = vmov %v2524_v10  ;;  %v634_v11 = vmov %v2526_v11 }
 0x11b   : >> { %v420_v61 = vrot.slane %v419_v58, 2  ;;  %v459_v62 = vadd.f32 %v458_v59, %v457_v57  ;;  %s512_s11 = smov %s466_s11  ;;  %s514_s12 = smov [#allocation21]  ;;  %v645_v10 = vmov %v2524_v10  ;;  %v648_v11 = vmov %v2526_v11 }
 0x11c   : >> { %v440_v63 = vrot.slane %v439_v60, 2  ;;  %s529_s3 = smov [#allocation22]  ;;  %s527_s13 = smov [#allocation23]  ;;  %vm638_vm0 = vcmp.eq.s32.totalorder %v634_v11, %v631_v10  ;;  %v604_v10 = vmov %v2524_v10  ;;  %v607_v11 = vmov %v2526_v11 }
 0x11d   : >> { %v421_v0 = vadd.f32 %v420_v61, %v419_v58  ;;  %v460_v1 = vrot.slane %v459_v62, 2  ;;  %s544_s14 = smov [#allocation23]  ;;  %s2570_s15 = smov [#allocation12]  ;;  %v618_v10 = vmov %v2524_v10  ;;  %v621_v11 = vmov %v2526_v11 }
 0x11e   : >> { %v441_v2 = vadd.f32 %v440_v63, %v439_v60  ;;  %s542_s16 = smov [#allocation24]  ;;  %s2572_s17 = smov [#allocation13]  ;;  %v552_v49 = vld [vmem:[%s2570_s15] sm:$0x3f]  ;;  %vm653_vm1 = vcmp.eq.s32.totalorder %v648_v11, %v645_v10  ;;  %vm612_vm3 = vcmp.eq.s32.totalorder %v607_v11, %v604_v10  ;;  %vm625_vm4 = vcmp.eq.s32.totalorder %v621_v11, %v618_v10 }
 0x11f   : >> { %v422_v3 = vrot.slane %v421_v0, 1  ;;  %v461_v4 = vadd.f32 %v460_v1, %v459_v62  ;;  %s2574_s18 = smov [#allocation14]  ;;  %s2576_s19 = smov [#allocation15]  ;;  %v553_v50 = vld [vmem:[%s2572_s17] sm:$0x3f]  ;;  %vm667_vm5 = vcmp.eq.s32.totalorder %v2524_v10, 0 }
 0x120   : >> { %v442_v5 = vrot.slane %v441_v2, 1  ;;  %s2578_s20 = smov [#allocation8]  ;;  %s2580_s22 = smov [#allocation9]  ;;  %v554_v51 = vld [vmem:[%s2574_s18] sm:$0x3f]  ;;  %vm671_vm6 = vcmp.eq.s32.totalorder %v2524_v10, 1 }
 0x121   : >> { %v423_v6 = vadd.f32 %v422_v3, %v421_v0  ;;  %v462_v7 = vrot.slane %v461_v4, 1  ;;  %s2582_s23 = smov [#allocation10]  ;;  %s768_s24 = smov [#allocation23]  ;;  %v555_v52 = vld [vmem:[%s2576_s19] sm:$0x3f]  ;;  %vm684_vm7 = vcmp.eq.s32.totalorder %v2524_v10, 5 }
 0x122   : >> { %v443_v8 = vadd.f32 %v442_v5, %v441_v2  ;;  %v776_v53 = vld [vmem:[%s2578_s20] sm:$0x3f]  ;;  %s404_s21 = sadd.s32 1, %s2413_s21  }
 0x123   : >> { %424 = vst [vmem:[%s406_s25] sm:$0x1] %v423_v6  ;;  %v463_v9 = vadd.f32 %v462_v7, %v461_v4  ;;  %s2586_s25 = smov [#allocation11]  ;;  %v777_v54 = vld [vmem:[%s2580_s22] sm:$0x3f]  ;;  %p401_p5 = scmp.ge.s32.totalorder %s404_s21, 11  }
 0x124   : >> { %444 = vst [vmem:[%s426_s1] sm:$0x1] %v443_v8  ;;  %v778_v55 = vld [vmem:[%s2582_s23] sm:$0x3f]  ;;  %s546_s1 = smov [#allocation24]  ;;  %v305_v10 = vmov (%p401_p5), %v2524_v10  ;;  %v308_v11 = vmov (%p401_p5), %v2526_v11 }
 0x125   : >> { %464 = vst [vmem:[%s446_s26] sm:$0x1] %v463_v9  ;;  %v779_v57 = vld [vmem:[%s2586_s25] sm:$0x3f]  ;;  %s770_s26 = smov [#allocation24]  ;;  %v358_v10 = vmov (%p401_p5), %v2524_v10 }
 0x12a   : >> { %v468_v14 = vld [vmem:[%s467_s28] sm:$0xff]  ;;  %s574_s28 = smov [#allocation22] }
 0x12b   : >> { %v470_v12 = vld [vmem:[%s469_s27] sm:$0xff]  ;;  %v491_v27 = vand.u32 2147483647, %v468_v14  ;;  %s572_s27 = smov [#allocation21] }
 0x12c   : >> { %v474_v13 = vmul.f32 2.0, %v470_v12  ;;  %v472_v15 = vld [vmem:[%s471_s29] sm:$0xff]  ;;  %v492_v32 = vand.u32 2147483647, %v470_v12  ;;  %s2602_s29 = smov [#allocation8] }
 0x12d   : >> { %v473_v16 = vsub.f32 %v472_v15, %v468_v14  ;;  %v493_v28 = vand.u32 2147483647, %v472_v15 }
 0x12e   : >> { %2135 = vrcp.f32 %v474_v13 }
 0x12f   : >> { %v494_v31 = vmin.f32 %v491_v27, %v493_v28 }
 0x131   : >> { %v495_v33 = vmul.f32 1.1920929e-08, %v494_v31 }
 0x133   : >> { %vm496_vm11 = vcmp.le.f32.partialorder %v492_v32, %v495_v33 }
 0x138   : >> { %v2136_v17 = vpop.eup %2135 }
 0x139   : >> { %v476_v18 = vmul.f32 %v2136_v17, %v473_v16 }
 0x13b   : >> { %v478_v19 = vmul.f32 %v476_v18, %v476_v18  ;;  %vm477_vm10 = vcmp.ge.f32.partialorder %v476_v18, 0.0 }
 0x13d   : >> { %v479_v20 = vadd.f32 1.0, %v478_v19 }
 0x13f   : >> { %2137 = vrsqrt.f32 %v479_v20  ;;  %vm482_vm8 = vcmp.eq.f32.partialorder %v479_v20, inf  ;;  %v485_v22 = vand.u32 2147483648, %v479_v20  ;;  %vm484_vm9 = vcmp.eq.f32.partialorder %v479_v20, 0.0 }
 0x149   : >> { %v2138_v21 = vpop.eup %2137 }
 0x14a   : >> { %v481_v23 = vmul.f32 %v2138_v21, %v479_v20 }
 0x14c   : >> { %v483_v24 = vsel %vm482_vm8, %v479_v20, %v481_v23  ;;  %vm320_vm8 = vcmp.eq.s32.totalorder (%p401_p5), %v308_v11, %v305_v10  ;;  %v361_v11 = vmov (%p401_p5), %v2526_v11  ;;  %v324_v10 = vmov (%p401_p5), %v2524_v10 }
 0x14d   : >> { %v486_v25 = vsel %vm484_vm9, %v485_v22, %v483_v24  ;;  %v327_v11 = vmov (%p401_p5), %v2526_v11  ;;  %v341_v10 = vmov (%p401_p5), %v2524_v10  ;;  %vm373_vm9 = vcmp.eq.s32.totalorder (%p401_p5), %v361_v11, %v358_v10 }
 0x14e   : >> { %v487_v26 = vxor.u32 2147483648, %v486_v25  ;;  %v344_v11 = vmov (%p401_p5), %v2526_v11 }
 0x150   : >> { %v488_v29 = vsel %vm477_vm10, %v486_v25, %v487_v26 }
 0x151   : >> { %v489_v30 = vadd.f32 %v488_v29, %v476_v18 }
 0x153   : >> { %2139 = vrcp.f32 %v489_v30 }
 0x15d   : >> { %v2140_v34 = vpop.eup %2139 }
 0x15e   : >> { %v497_v35 = vsel %vm496_vm11, 0.0, %v2140_v34 }
 0x15f   : >> { %v498_v36 = vmul.f32 %v497_v35, %v497_v35  ;;  %v502_v37 = vmul.f32 %v497_v35, %v470_v12 }
 0x161   : >> { %v499_v38 = vadd.f32 1.0, %v498_v36  ;;  %v503_v39 = vsub.f32 %v468_v14, %v502_v37  ;;  %v505_v40 = vadd.f32 %v502_v37, %v472_v15 }
 0x163   : >> { %2141 = vrsqrt.f32 %v499_v38  ;;  %507 = vst [vmem:[%s506_s30] sm:$0xff] %v503_v39  ;;  %509 = vst [vmem:[%s508_s2] sm:$0xff] %v505_v40  ;;  %s2604_s30 = smov [#allocation14]  ;;  %s2606_s2 = smov [#allocation15] }
 0x16d   : >> { %v2142_v41 = vpop.eup %2141 }
 0x16e   : >> { %511 = vst [vmem:[%s510_s10] sm:$0xff] %v2142_v41  ;;  %v501_v42 = vmul.f32 %v2142_v41, %v497_v35  ;;  %s2608_s10 = smov [#allocation12] }
 0x170   : >> { %513 = vst [vmem:[%s512_s11] sm:$0xff] %v501_v42  ;;  %s2610_s11 = smov [#allocation10] }
 0x175   : >> { %v515_v43 = vld [vmem:[%s514_s12] ss:$0 sm:$0xff]  ;;  %s2612_s12 = smov [#allocation9] }
 0x176   : >> { %v524_v44 = vsel %vm523_vm12, %v515_v43, 0.0  ;;  %v573_v23 = vld [vmem:[%s572_s27] ss:$0 sm:$0xff]  ;;  %s744_s27 = smov [#allocation13] }
 0x177   : >> { %525 = vadd.xlane.f32.xlu0 %v524_v44  ;;  %v530_v45 = vld [vmem:[%s529_s3] ss:$0 sm:$0xff]  ;;  %s2616_s3 = smov [#allocation11] }
 0x178   : >> { %v539_v46 = vsel %vm538_vm13, %v530_v45, 0.0  ;;  %v575_v24 = vld [vmem:[%s574_s28] ss:$0 sm:$0xff]  ;;  %s721_s28 = smov [#allocation14] }
 0x17b   : >> { %540 = vadd.xlane.f32.xlu0 %v539_v46 }
 0x204   : >> { %v526_v47 = vpop.xlane.xlu0 %525 }
 0x205   : >> { %528 = vst [vmem:[%s527_s13] sm:$0xff] %v526_v47  ;;  %s2618_s13 = smov [#allocation13] }
 0x208   : >> { %v541_v48 = vpop.xlane.xlu0 %540 }
 0x209   : >> { %543 = vst [vmem:[%s542_s16] sm:$0xff] %v541_v48  ;;  %s641_s16 = smov [#allocation15] }
 0x20c   : >> { %v545_v56 = vld [vmem:[%s544_s14] sm:$0xff]  ;;  %s642_s14 = smov [#allocation20] }
 0x20d   : >> { %v769_v58 = vld [vmem:[%s768_s24] sm:$0xff]  ;;  %v556_v59 = vmul.f32 %v552_v49, %v545_v56  ;;  %v559_v60 = vmul.f32 %v553_v50, %v545_v56  ;;  %v563_v61 = vmul.f32 %v554_v51, %v545_v56  ;;  %v566_v62 = vmul.f32 %v555_v52, %v545_v56  ;;  %s657_s24 = smov [#allocation13] }
 0x20e   : >> { %v780_v63 = vmul.f32 %v776_v53, %v769_v58  ;;  %v783_v0 = vmul.f32 %v777_v54, %v769_v58  ;;  %v787_v1 = vmul.f32 %v778_v55, %v769_v58  ;;  %v790_v2 = vmul.f32 %v779_v57, %v769_v58 }
 0x210   : >> { %v547_v3 = vld [vmem:[%s546_s1] sm:$0xff]  ;;  %s2663_s1 = smov [#allocation15] }
 0x211   : >> { %v771_v4 = vld [vmem:[%s770_s26] sm:$0xff]  ;;  %v557_v5 = vmul.f32 %v554_v51, %v547_v3  ;;  %v560_v6 = vmul.f32 %v555_v52, %v547_v3  ;;  %v562_v7 = vmul.f32 %v552_v49, %v547_v3  ;;  %v565_v8 = vmul.f32 %v553_v50, %v547_v3  ;;  %s720_s26 = smov [#allocation12] }
 0x212   : >> { %v781_v9 = vmul.f32 %v778_v55, %v771_v4  ;;  %v784_v12 = vmul.f32 %v779_v57, %v771_v4  ;;  %v786_v13 = vmul.f32 %v776_v53, %v771_v4  ;;  %v789_v14 = vmul.f32 %v777_v54, %v771_v4  ;;  %v649_v55 = vld [vmem:[%s642_s14] ss:$0 sm:$0xff] }
 0x213   : >> { %v558_v15 = vsub.f32 %v556_v59, %v557_v5  ;;  %v561_v16 = vsub.f32 %v559_v60, %v560_v6  ;;  %v564_v17 = vadd.f32 %v563_v61, %v562_v7  ;;  %v567_v18 = vadd.f32 %v566_v62, %v565_v8 }
 0x214   : >> { %v782_v19 = vsub.f32 %v780_v63, %v781_v9  ;;  %v785_v20 = vsub.f32 %v783_v0, %v784_v12  ;;  %v788_v21 = vadd.f32 %v787_v1, %v786_v13  ;;  %v791_v22 = vadd.f32 %v790_v2, %v789_v14 }
 0x215   : >> { %569 = vst [vmem:[%s2572_s17] sm:$0x3f] %v561_v16  ;;  %571 = vst [vmem:[%s2576_s19] sm:$0x3f] %v567_v18  ;;  %s601_s17 = smov [#allocation19]  ;;  %s615_s19 = smov [#allocation13] }
 0x216   : >> { %568 = vst [vmem:[%s2570_s15] sm:$0x3f] %v558_v15  ;;  %570 = vst [vmem:[%s2574_s18] sm:$0x3f] %v564_v17  ;;  %s628_s15 = smov [#allocation14]  ;;  %s600_s18 = smov [#allocation12]  ;;  %v608_v59 = vld [vmem:[%s601_s17] ss:$0 sm:$0xff] }
 0x217   : >> { %792 = vst [vmem:[%s2578_s20] sm:$0x3f] %v782_v19  ;;  %793 = vst [vmem:[%s2580_s22] sm:$0x3f] %v785_v20  ;;  %s2660_s20 = smov [#allocation14]  ;;  %s2448_s22 = smov 1  }
 0x218   : >> { %794 = vst [vmem:[%s2582_s23] sm:$0x3f] %v788_v21  ;;  %795 = vst [vmem:[%s2586_s25] sm:$0x3f] %v791_v22  ;;  %s656_s23 = smov [#allocation12]  ;;  %s2449_s25 = smov 127  }
 0x21c   : >> { %v583_v26 = vld [vmem:[%s2606_s2] sm:$0x3f] }
 0x21d   : >> { %v582_v25 = vld [vmem:[%s2604_s30] sm:$0x3f]  ;;  %v591_v32 = vmul.f32 %v583_v26, %v575_v24  ;;  %v594_v38 = vmul.f32 %v583_v26, %v573_v23 }
 0x21e   : >> { %v580_v27 = vld [vmem:[%s2608_s10] sm:$0x3f]  ;;  %v590_v31 = vmul.f32 %v582_v25, %v573_v23  ;;  %v593_v33 = vmul.f32 %v582_v25, %v575_v24 }
 0x21f   : >> { %v798_v28 = vld [vmem:[%s2602_s29] ss:$0 sm:$0xff]  ;;  %v1627_v30 = vld [vmem:[%s2602_s29 + $0x5] ss:$0 sm:$0xff]  ;;  %v584_v44 = vmul.f32 %v580_v27, %v573_v23  ;;  %v587_v45 = vmul.f32 %v580_v27, %v575_v24 }
 0x220   : >> { %v1626_v29 = vld [vmem:[%s2602_s29 - $0x1] sm:$0x3e]  ;;  %v1631_v41 = vld [vmem:[%s2612_s12 + $0x5] ss:$0 sm:$0xff]  ;;  %v592_v43 = vsub.f32 %v590_v31, %v591_v32  ;;  %v595_v49 = vadd.f32 %v594_v38, %v593_v33 }
 0x221   : >> { %v805_v34 = vsel %vm728_vm14, %v798_v28, %v1626_v29  ;;  %v809_v35 = vld [vmem:[%s2610_s11] ss:$0 sm:$0xff]  ;;  %v1629_v36 = vld [vmem:[%s2610_s11 + $0x1] sm:$0x1f] }
 0x222   : >> { %v822_v37 = vld [vmem:[%s2612_s12] ss:$0 sm:$0xff]  ;;  %808 = vst [vmem:[%s2602_s29] sm:$0x3f] %v805_v34  ;;  %v817_v39 = vsel %vm740_vm15, %v1627_v30, %v1629_v36  ;;  %v1633_v47 = vld [vmem:[%s2616_s3 + $0x1] sm:$0x1f]  ;;  %598 = vst [vmem:[%s2604_s30] sm:$0x3f] %v592_v43 }
 0x223   : >> { %v1630_v40 = vld [vmem:[%s2612_s12 - $0x1] sm:$0x3e]  ;;  %1628 = vst [vmem:[%s2602_s29 + $0x1] sm:$0x1] %v809_v35  ;;  %819 = vst [vmem:[%s2610_s11] sm:$0x3f] %v817_v39  ;;  %v841_v50 = vsel %vm740_vm15, %v1631_v41, %v1633_v47  ;;  %s745_s29 = smov [#allocation15] }
 0x224   : >> { %v833_v42 = vld [vmem:[%s2616_s3] ss:$0 sm:$0xff]  ;;  %v829_v46 = vsel %vm728_vm14, %v822_v37, %v1630_v40  ;;  %599 = vst [vmem:[%s2606_s2] sm:$0x3f] %v595_v49  ;;  %s844_s30 = sadd.s32 (%p401_p5), 1, %s2409_s0   ;;  %s309_s2 = smov (%p401_p5), [#allocation12] }
 0x225   : >> { %v581_v48 = vld [vmem:[%s2618_s13] sm:$0x3f]  ;;  %832 = vst [vmem:[%s2612_s12] sm:$0x3f] %v829_v46  ;;  %843 = vst [vmem:[%s2616_s3] sm:$0x3f] %v841_v50  ;;  %s345_s11 = smov (%p401_p5), [#allocation14]  ;;  %p397_p6 = scmp.ge.s32.totalorder (%p401_p5), %s844_s30, 15 }
 0x226   : >> { %v585_v51 = vmul.f32 %v581_v48, %v575_v24  ;;  %v588_v52 = vmul.f32 %v581_v48, %v573_v23  ;;  %1632 = vst [vmem:[%s2612_s12 + $0x1] sm:$0x1] %v833_v42  ;;  %s362_s12 = smov (%p401_p5), [#allocation15]  ;;  %s2752_s0 = smov (%p401_p5), %s844_s30 }
 0x228   : >> { %v586_v53 = vsub.f32 %v584_v44, %v585_v51  ;;  %v589_v54 = vadd.f32 %v588_v52, %v587_v45 }
 0x229   : >> { %v635_v56 = vld [vmem:[%s628_s15] sm:$0x3f] }
 0x22a   : >> { %596 = vst [vmem:[%s2608_s10] sm:$0x3f] %v586_v53  ;;  %597 = vst [vmem:[%s2618_s13] sm:$0x3f] %v589_v54  ;;  %v639_v57 = vsel %vm638_vm0, 0.0, %v635_v56  ;;  %s328_s10 = smov (%p401_p5), [#allocation13] }
 0x22b   : >> { %v650_v58 = vld [vmem:[%s641_s16] sm:$0x3f]  ;;  %640 = vst [vmem:[%s628_s15] sm:$0x3f] %v639_v57 }
 0x22c   : >> { %v654_v60 = vsel %vm653_vm1, %v649_v55, %v650_v58 }
 0x22d   : >> { %655 = vst [vmem:[%s641_s16] sm:$0x3f] %v654_v60 }
 0x231   : >> { %v609_v61 = vld [vmem:[%s600_s18] sm:$0x3f] }
 0x232   : >> { %v622_v62 = vld [vmem:[%s615_s19] sm:$0x3f]  ;;  %v613_v63 = vsel %vm612_vm3, %v608_v59, %v609_v61 }
 0x233   : >> { %v626_v0 = vsel %vm625_vm4, 0.0, %v622_v62  ;;  %614 = vst [vmem:[%s600_s18] sm:$0x3f] %v613_v63  ;;  %v694_v1 = vld [vmem:[%s2660_s20] sm:$0x3f] }
 0x234   : >> { %627 = vst [vmem:[%s615_s19] sm:$0x3f] %v626_v0  ;;  %695 = vrot.lane.b32.xlu0 %v694_v1, %s2448_s22  ;;  %v690_v5 = vld [vmem:[%s2663_s1] sm:$0x3f] }
 0x235   : >> { %v711_v6 = vld [vmem:[%s2663_s1] sm:$0x3f] }
 0x236   : >> { %v693_v26 = vld [vmem:[%s2660_s20] sm:$0x3f] }
 0x23a   : >> { %v662_v2 = vld [vmem:[%s656_s23] sm:$0x3f] }
 0x23b   : >> { %663 = vrot.lane.b32.xlu1 %v662_v2, %s2448_s22  ;;  %v658_v3 = vld [vmem:[%s657_s24] sm:$0x3f] }
 0x23c   : >> { %v679_v4 = vld [vmem:[%s657_s24] sm:$0x3f] }
 0x23d   : >> { %v661_v14 = vld [vmem:[%s656_s23] sm:$0x3f] }
 0x23f   : >> { %659 = vrot.lane.b32.xlu1 %v658_v3, %s2448_s22 }
 0x243   : >> { %680 = vrot.lane.b32.xlu1 %v679_v4, %s2449_s25 }
 0x247   : >> { %691 = vrot.lane.b32.xlu1 %v690_v5, %s2448_s22 }
 0x24b   : >> { %712 = vrot.lane.b32.xlu1 %v711_v6, %s2449_s25 }
 0x2a6   : >> { %v696_v16 = vpop.permute.xlu0 %695 }
 0x2a7   : >> { %v700_v18 = vsel %vm667_vm5, %v694_v1, %v696_v16 }
 0x2ad   : >> { %v664_v7 = vpop.permute.xlu1 %663 }
 0x2ae   : >> { %v668_v8 = vsel %vm667_vm5, %v662_v2, %v664_v7 }
 0x2b1   : >> { %v660_v9 = vpop.permute.xlu1 %659 }
 0x2b2   : >> { %v672_v12 = vsel %vm671_vm6, %v660_v9, %v668_v8 }
 0x2b3   : >> { %v678_v13 = vsel %vm1405_vm2, %v672_v12, 0.0 }
 0x2b4   : >> { %686 = vst [vmem:[%s656_s23] sm:$0x3f] %v678_v13 }
 0x2b5   : >> { %v681_v15 = vpop.permute.xlu1 %680 }
 0x2b6   : >> { %v685_v17 = vsel %vm684_vm7, %v661_v14, %v681_v15 }
 0x2b7   : >> { %687 = vst [vmem:[%s657_s24] sm:$0x3f] %v685_v17 }
 0x2b9   : >> { %v692_v19 = vpop.permute.xlu1 %691 }
 0x2ba   : >> { %v704_v20 = vsel %vm671_vm6, %v692_v19, %v700_v18 }
 0x2bb   : >> { %v722_v21 = vld [vmem:[%s720_s26] ss:$0 sm:$0xff]  ;;  %v1619_v23 = vld [vmem:[%s720_s26 + $0x5] ss:$0 sm:$0xff]  ;;  %v710_v25 = vsel %vm1405_vm2, %v704_v20, 0.0 }
 0x2bc   : >> { %v1618_v22 = vld [vmem:[%s720_s26 - $0x1] sm:$0x3e]  ;;  %718 = vst [vmem:[%s2660_s20] sm:$0x3f] %v710_v25 }
 0x2bd   : >> { %v729_v24 = vsel %vm728_vm14, %v722_v21, %v1618_v22  ;;  %v713_v27 = vpop.permute.xlu1 %712 }
 0x2be   : >> { %732 = vst [vmem:[%s720_s26] sm:$0x3f] %v729_v24  ;;  %v746_v28 = vld [vmem:[%s744_s27] ss:$0 sm:$0xff]  ;;  %v1623_v30 = vld [vmem:[%s744_s27 + $0x5] ss:$0 sm:$0xff]  ;;  %v717_v31 = vsel %vm684_vm7, %v693_v26, %v713_v27 }
 0x2bf   : >> { %v1622_v29 = vld [vmem:[%s744_s27 - $0x1] sm:$0x3e]  ;;  %719 = vst [vmem:[%s2663_s1] sm:$0x3f] %v717_v31 }
 0x2c0   : >> { %v753_v32 = vsel %vm728_vm14, %v746_v28, %v1622_v29 }
 0x2c1   : >> { %756 = vst [vmem:[%s744_s27] sm:$0x3f] %v753_v32 }
 0x2c3   : >> { %v733_v33 = vld [vmem:[%s721_s28] ss:$0 sm:$0xff]  ;;  %v1621_v34 = vld [vmem:[%s721_s28 + $0x1] sm:$0x1f] }
 0x2c4   : >> { %1620 = vst [vmem:[%s720_s26 + $0x1] sm:$0x1] %v733_v33  ;;  %v741_v35 = vsel %vm740_vm15, %v1619_v23, %v1621_v34  ;;  %403 = sbr.rel (!%p401_p5) target bundleno = 276 (0x114), region = 435 }
 0x2c5   : >> { %743 = vst [vmem:[%s721_s28] sm:$0x3f] %v741_v35 }
 0x2c6   : >> { %v757_v36 = vld [vmem:[%s745_s29] ss:$0 sm:$0xff]  ;;  %v1625_v37 = vld [vmem:[%s745_s29 + $0x1] sm:$0x1f] }
 0x2c7   : >> { %1624 = vst [vmem:[%s744_s27 + $0x1] sm:$0x1] %v757_v36  ;;  %v765_v38 = vsel %vm740_vm15, %v1623_v30, %v1625_v37 }
 0x2c8   : >> { %767 = vst [vmem:[%s745_s29] sm:$0x3f] %v765_v38 }
 0x2cb   : > { %v315_v39 = vld [vmem:[%s309_s2] sm:$0x3f] }
 0x2cc   : > { %v316_v41 = vsel %vm1405_vm2, %v315_v39, 0.0  ;;  %v351_v43 = vld [vmem:[%s345_s11] sm:$0x3f] }
 0x2cd   : > { %v317_v45 = vmul.f32 %v316_v41, %v316_v41  ;;  %v352_v47 = vsel %vm1405_vm2, %v351_v43, 0.0 }
 0x2ce   : > { %v334_v40 = vld [vmem:[%s328_s10] sm:$0x3f]  ;;  %v353_v49 = vmul.f32 %v352_v47, %v352_v47 }
 0x2cf   : > { %v335_v42 = vsel %vm1405_vm2, %v334_v40, 0.0  ;;  %v368_v44 = vld [vmem:[%s362_s12] sm:$0x3f]  ;;  %v321_v52 = vsel %vm320_vm8, 0.0, %v317_v45 }
 0x2d0   : > { %v336_v46 = vmul.f32 %v335_v42, %v335_v42  ;;  %v369_v48 = vsel %vm1405_vm2, %v368_v44, 0.0 }
 0x2d1   : > { %v370_v51 = vmul.f32 %v369_v48, %v369_v48 }
 0x2d2   : > { %v338_v50 = vadd.f32 %v336_v46, %v317_v45  ;;  %v337_v53 = vadd.f32 %v336_v46, %v321_v52 }
 0x2d3   : > { %v374_v56 = vsel %vm373_vm9, 0.0, %v370_v51 }
 0x2d4   : > { %v355_v54 = vadd.f32 %v353_v49, %v338_v50  ;;  %v354_v55 = vadd.f32 %v353_v49, %v337_v53 }
 0x2d6   : > { %v376_v57 = vadd.f32 %v370_v51, %v355_v54  ;;  %v375_v58 = vadd.f32 %v374_v56, %v354_v55 }
 0x2d8   : > { %377 = vadd.xlane.f32.xlu0 %v376_v57 }
 0x2dc   : > { %385 = vadd.xlane.f32.xlu0 %v375_v58 }
 0x365   : > { %v378_v59 = vpop.xlane.xlu0 %377 }
 0x366   : > { %v379_v60 = vrot.slane %v378_v59, 4 }
 0x368   : > { %v380_v61 = vadd.f32 %v379_v60, %v378_v59 }
 0x369   : > { %v386_v62 = vpop.xlane.xlu0 %385 }
 0x36a   : > { %v381_v63 = vrot.slane %v380_v61, 2  ;;  %v387_v0 = vrot.slane %v386_v62, 4 }
 0x36c   : > { %v388_v1 = vadd.f32 %v387_v0, %v386_v62  ;;  %v382_v2 = vadd.f32 %v381_v63, %v380_v61 }
 0x36e   : > { %v389_v3 = vrot.slane %v388_v1, 2  ;;  %v383_v5 = vrot.slane %v382_v2, 1 }
 0x370   : > { %v390_v4 = vadd.f32 %v389_v3, %v388_v1  ;;  %v384_v8 = vadd.f32 %v383_v5, %v382_v2 }
 0x372   : > { %v391_v6 = vrot.slane %v390_v4, 1 }
 0x374   : > { %v392_v7 = vadd.f32 %v391_v6, %v390_v4 }
 0x376   : > { %1660 = vpush %v392_v7 }
 0x377   : > { %1662 = vpush %v384_v8 }
 0x3a7   : > { %s1661_s21 = spop %1660 }
 0x3a8   : > { %s1663_s3 = spop %1662 }
 0x3a9   : > { %s395_s13 = smul.f32 1e-10, %s1663_s3 }
 0x3ab   : > { %p396_p7 = scmp.le.f32.partialorder %s1661_s21, %s395_s13 }
 0x3ad   : > { %p398_p8 = por %p397_p6, %p396_p7 }
 0x3af   :  { %846 = sbr.rel (!%p398_p8) target bundleno = 275 (0x113), region = 446 }
 0x3b6 PF:  { %s847_s14 = smov [#allocation12]  ;;  %v851_v10 = vmov %v2524_v10  ;;  %v854_v11 = vmov %v2526_v11  ;;  %s867_s15 = smov [#allocation15] }
 0x3b7   :  { %v871_v10 = vmov %v2524_v10  ;;  %v874_v11 = vmov %v2526_v11  ;;  %v855_v9 = vld [vmem:[%s847_s14] sm:$0x3f]  ;;  %vm858_vm10 = vcmp.eq.s32.totalorder %v854_v11, %v851_v10  ;;  %s848_s0 = smov [#allocation4]  ;;  %s868_s16 = smov [#allocation6] }
 0x3b8   :  { %vm878_vm11 = vcmp.eq.s32.totalorder %v874_v11, %v871_v10  ;;  %v859_v12 = vsel %vm858_vm10, %v855_v9, 0.0  ;;  %v875_v13 = vld [vmem:[%s867_s15] sm:$0x3f]  ;;  %s2415_s24 = smov %s2748_s6   ;;  %s2419_s25 = smov [#allocation8]  }
 0x3b9   :  { %v860_v14 = vrot.slane %v859_v12, 4  ;;  %v879_v15 = vsel %vm878_vm11, %v875_v13, 0.0 }
 0x3ba   :  { %v880_v16 = vrot.slane %v879_v15, 4 }
 0x3bb   :  { %v861_v17 = vadd.f32 %v860_v14, %v859_v12 }
 0x3bc   :  { %v881_v18 = vadd.f32 %v880_v16, %v879_v15 }
 0x3bd   :  { %v862_v19 = vrot.slane %v861_v17, 2 }
 0x3be   :  { %v882_v20 = vrot.slane %v881_v18, 2 }
 0x3bf   :  { %v863_v21 = vadd.f32 %v862_v19, %v861_v17 }
 0x3c0   :  { %v883_v22 = vadd.f32 %v882_v20, %v881_v18 }
 0x3c1   :  { %v864_v23 = vrot.slane %v863_v21, 1 }
 0x3c2   :  { %v884_v24 = vrot.slane %v883_v22, 1 }
 0x3c3   :  { %v865_v25 = vadd.f32 %v864_v23, %v863_v21 }
 0x3c4   :  { %v885_v26 = vadd.f32 %v884_v24, %v883_v22 }
 0x3c5   :  { %866 = vst [vmem:[%s848_s0] sm:$0x1] %v865_v25 }
 0x3c6   :  { %886 = vst [vmem:[%s868_s16] sm:$0x1] %v885_v26 }
 0x3cc   :  { %v890_v10 = vld [vmem:[#allocation4] sm:$0x1] }
 0x3cd   :  { %892 = vst [vmem:[#allocation5] sm:$0x1] %v890_v10  ;;  %v896_v11 = vld [vmem:[#allocation6] sm:$0x1] }
 0x3ce   :  { %898 = vst [vmem:[#allocation7] sm:$0x1] %v896_v11 }
 0x3d4   :  { %v961_v27 = vld [vmem:[#allocation5] sm:$0x1] }
 0x3d5   :  { %962 = vst [vmem:[%s2746_s4] sm:$0x1] %v961_v27  ;;  %v1025_v28 = vld [vmem:[#allocation7] sm:$0x1] }
 0x3d6   :  { %1026 = vst [vmem:[%s2747_s5] sm:$0x1] %v1025_v28 }
 0x3d7 LB: > { %v1074_v29 = vld [vmem:[%s2421_s25] sm:$0xff]  ;;  %s1076_s25 = scalar_lea.vmem %s2421_s25, 8   ;;  %s2421_s25 = sphi %s2419_s25, %s1076_s25   ;;  %s2417_s24 = sphi %s2415_s24, %s1077_s24  }
 0x3d8   : > { %1075 = vst [vmem:[%s2417_s24] sm:$0xff] %v1074_v29  ;;  %s1077_s24 = scalar_lea.vmem %s2417_s24, 8   ;;  %p1071_p9 = scmp.gt.s32.totalorder %s1076_s25, [#allocation8] }
 0x3d9   :  { %s2423_s5 = smov (%p1071_p9), %s2749_s7   ;;  %s2427_s26 = smov (%p1071_p9), [#allocation9]  }
 0x3da   :  { %1073 = sbr.rel (!%p1071_p9) target bundleno = 983 (0x3d7), region = 512 }
 0x3e1 LB: > { %v1136_v30 = vld [vmem:[%s2429_s26] sm:$0xff]  ;;  %s1138_s26 = scalar_lea.vmem %s2429_s26, 8   ;;  %s2429_s26 = sphi %s2427_s26, %s1138_s26   ;;  %s2425_s5 = sphi %s2423_s5, %s1139_s5  }
 0x3e2   : > { %1137 = vst [vmem:[%s2425_s5] sm:$0xff] %v1136_v30  ;;  %s1139_s5 = scalar_lea.vmem %s2425_s5, 8   ;;  %p1133_p10 = scmp.gt.s32.totalorder %s1138_s26, [#allocation9] }
 0x3e3   :  { %s2431_s28 = smov (%p1133_p10), %s2750_s8   ;;  %s2435_s29 = smov (%p1133_p10), [#allocation10]  }
 0x3e4   :  { %1135 = sbr.rel (!%p1133_p10) target bundleno = 993 (0x3e1), region = 534 }
 0x3eb LB: > { %v1198_v31 = vld [vmem:[%s2437_s29] sm:$0xff]  ;;  %s1200_s29 = scalar_lea.vmem %s2437_s29, 8   ;;  %s2437_s29 = sphi %s2435_s29, %s1200_s29   ;;  %s2433_s28 = sphi %s2431_s28, %s1201_s28  }
 0x3ec   : > { %1199 = vst [vmem:[%s2433_s28] sm:$0xff] %v1198_v31  ;;  %s1201_s28 = scalar_lea.vmem %s2433_s28, 8   ;;  %p1195_p11 = scmp.gt.s32.totalorder %s1200_s29, [#allocation10] }
 0x3ed   :  { %s2439_s2 = smov (%p1195_p11), %s2751_s9   ;;  %s2443_s10 = smov (%p1195_p11), [#allocation11]  }
 0x3ee   :  { %1197 = sbr.rel (!%p1195_p11) target bundleno = 1003 (0x3eb), region = 556 }
 0x3f5 LB: > { %v1260_v32 = vld [vmem:[%s2445_s10] sm:$0xff]  ;;  %s1262_s10 = scalar_lea.vmem %s2445_s10, 8   ;;  %s2445_s10 = sphi %s2443_s10, %s1262_s10   ;;  %s2441_s2 = sphi %s2439_s2, %s1263_s2  }
 0x3f6   : > { %1261 = vst [vmem:[%s2441_s2] sm:$0xff] %v1260_v32  ;;  %s1263_s2 = scalar_lea.vmem %s2441_s2, 8   ;;  %p1257_p12 = scmp.gt.s32.totalorder %s1262_s10, [#allocation11] }
 0x3f8   :  { %1259 = sbr.rel (!%p1257_p12) target bundleno = 1013 (0x3f5), region = 578 }

// kernel: reverse
= control target key start
LH: loop header
LB: loop body
LE: loop exit
PB: predicated region body
PF: predicated region fallthrough
CT: control target
= control target key end

     0   :  { %v2_v0 = vlaneseq  ;;  %s123_s0 = inlined_call_operand.vmem [shape: f32[12], index: 0, kind: input, shape index: {}]   ;;  %s124_s1 = inlined_call_operand.vmem [shape: f32[12], index: 1, kind: output, shape index: {}]  }
   0x2   :  { %v3_v1 = vsub.s32 11, %v2_v0 }
   0x4   :  { %4 = vset.pattern.permute.xlu0 %v3_v1 }
   0x5   :  { %v43_v2 = vld [vmem:[#allocation1] sm:$0x1]  ;;  %v21_v3 = vld [vmem:[%s123_s0] sm:$0x1]  ;;  %v58_v10 = vshrl.u32 %v2_v0, 7 }
   0x6   :  { %44 = vst [vmem:[#allocation0] sm:$0x1] %v43_v2  ;;  %22 = vst [vmem:[#allocation1 + $0x1] sm:$0x1] %v21_v3 }
   0x7   :  { %vm59_vm0 = vcmp.lt.s32.totalorder %v58_v10, 1 }
   0xd   :  { %v46_v4 = vld [vmem:[#allocation0 + $0x7] ss:$-1 sm:$0xff]  ;;  %v40_v5 = vld [vmem:[#allocation1 + $0x1] sm:$0x1] }
   0xe   :  { %v47_v6 = vrot.slane %v46_v4, 7  ;;  %42 = vst [vmem:[#allocation0 + $0x8] sm:$0x1] %v40_v5 }
  0x10   :  { %48 = vperm.xlu0 %4, %v47_v6  }
  0x15   :  { %v53_v7 = vld [vmem:[#allocation0 + $0xf] ss:$-1 sm:$0xff] }
  0x16   :  { %v54_v8 = vrot.slane %v53_v7, 7 }
  0x18   :  { %55 = vperm.xlu0 %4, %v54_v8  }
  0x8f   :  { %v49_v9 = vpop.permute.xlu0 %48 }
  0x90   :  { %50 = vst [vmem:[#allocation2] sm:$0xff] %v49_v9 }
  0x97   :  { %v56_v11 = vpop.permute.xlu0 %55 }
  0x98   :  { %60 = vst.msk [vmem:[#allocation2] sm:$0xff] %vm59_vm0, %v56_v11 }
  0x9f   :  { %v64_v12 = vld [vmem:[#allocation2] sm:$0x1] }
  0xa0   :  { %66 = vst [vmem:[#allocation3] sm:$0x1] %v64_v12 }
  0xa7   :  { %v82_v13 = vld [vmem:[#allocation3] sm:$0x1] }
  0xa8   :  { %83 = vst [vmem:[%s124_s1] sm:$0x1] %v82_v13 }

// kernel: custom-call.10
= control target key start
LH: loop header
LB: loop body
LE: loop exit
PB: predicated region body
PF: predicated region fallthrough
CT: control target
= control target key end

     0   :  { %v395_v2 = vmov 0.0   ;;  %s418_s13 = smov 0   ;;  %s502_s0 = inlined_call_operand.vmem [shape: f32[12,12], index: 0, kind: input, shape index: {}]   ;;  %s503_s1 = inlined_call_operand.vmem [shape: f32[12,12], index: 1, kind: output, shape index: {0}]   ;;  %s504_s2 = inlined_call_operand.vmem [shape: f32[12], index: 2, kind: output, shape index: {1}]  }
   0x1   :  { %v33_v0 = vld [vmem:[%s502_s0] sm:$0xff]  ;;  %v35_v1 = vld [vmem:[%s502_s0 + $0x8] sm:$0xff]  ;;  %46 = vst [vmem:[#allocation2] sm:$0x1] %v395_v2 }
   0x2   :  { %41 = vst [vmem:[#allocation1] sm:$0xff] %v33_v0  ;;  %45 = vst [vmem:[#allocation1 + $0x8] sm:$0xff] %v35_v1 }
   0x3 LB: > { %v54_v3 = vlaneseq  ;;  %v427_v6 = vstv %s393_s13  ;;  %s91_s0 = scalar_lea.vmem [#allocation1], %s393_s13  ;;  %s127_s14 = smov [#allocation1]  ;;  %s393_s13 = sphi %s418_s13, %s52_s13  }
   0x4   : > { %s167_s15 = scalar_lea.vmem [#allocation4], %s393_s13  ;;  %s183_s16 = smov [#allocation1] }
   0x5   : > { %v424_v5 = vshrl.u32 %v54_v3, 7  ;;  %v453_v54 = vand.u32 127, %v54_v3  ;;  %s184_s17 = smov [#allocation4] }
   0x7   : > { %vm58_vm0 = vcmp.gt.s32.totalorder %v424_v5, %v427_v6  ;;  %v65_v7 = vadd.s32 8, %v424_v5  ;;  %v130_v5 = vmov %v424_v5  ;;  %vm457_vm14 = vcmp.eq.s32.totalorder %v453_v54, %v427_v6 }
   0x8   : > { %v149_v50 = vadd.s32 8, %v130_v5  ;;  %vm134_vm12 = vcmp.gt.s32.totalorder %v130_v5, %v427_v6  ;;  %v187_v5 = vmov %v424_v5 }
   0x9   : > { %v53_v4 = vld [vmem:[#allocation1] sm:$0xff]  ;;  %v62_v9 = vld [vmem:[#allocation1 + $0x8] sm:$0xff]  ;;  %vm67_vm1 = vcmp.gt.s32.totalorder %v65_v7, %v427_v6  ;;  %vm68_vm2 = vcmp.lt.s32.totalorder %v65_v7, 12  ;;  %v180_v7 = vld [vmem:[#allocation2] ss:$0 sm:$0xff] }
   0xa   : > { %v59_v8 = vsel %vm58_vm0, %v53_v4, 0.0  ;;  %vm69_vm3 = vmand %vm67_vm1, %vm68_vm2  ;;  %v92_v20 = vld [vmem:[%s91_s0] ss:$0 sm:$0xff]  ;;  %vm151_vm10 = vcmp.gt.s32.totalorder %v149_v50, %v427_v6  ;;  %vm152_vm11 = vcmp.lt.s32.totalorder %v149_v50, 12  ;;  %v361_v53 = vld [vmem:[%s127_s14 + $0x8] sm:$0xff]  ;;  %vm220_vm2 = vcmp.gt.s32.totalorder %v453_v54, %v427_v6 }
   0xb   : > { %v60_v10 = vmul.f32 %v59_v8, %v59_v8  ;;  %v70_v11 = vsel %vm69_vm3, %v62_v9, 0.0  ;;  %v93_v21 = vand.u32 2147483647, %v92_v20  ;;  %vm118_vm9 = vcmp.lt.f32.partialorder %v92_v20, 0.0  ;;  %v131_v52 = vld [vmem:[%s127_s14] sm:$0xff]  ;;  %vm153_vm13 = vmand %vm151_vm10, %vm152_vm11 }
   0xc   : > { %v71_v12 = vmul.f32 %v70_v11, %v70_v11  ;;  %v135_v56 = vsel %vm134_vm12, %v131_v52, 0.0  ;;  %v154_v57 = vsel %vm153_vm13, %v361_v53, 0.0 }
   0xd   : > { %v94_v26 = vmax.f32 %v93_v21, 0.0 }
   0xe   : > { %v72_v13 = vadd.f32 %v71_v12, %v60_v10  ;;  %v396_v12 = vmov 1.0  }
  0x10   : > { %v73_v14 = vrot.slane %v72_v13, 4 }
  0x12   : > { %v74_v15 = vadd.f32 %v73_v14, %v72_v13  ;;  %v192_v13 = vadd.s32 8, %v187_v5  ;;  %v190_v14 = vld [vmem:[%s183_s16] sm:$0xff]  ;;  %v211_v5 = vmov %v424_v5 }
  0x13   : > { %vm228_vm0 = vcmp.ge.s32.totalorder %v211_v5, %v427_v6 }
  0x14   : > { %v75_v16 = vrot.slane %v74_v15, 2  ;;  %vm198_vm15 = vcmp.lt.s32.totalorder %v192_v13, 12  ;;  %vm229_vm3 = vmand %vm457_vm14, %vm228_vm0 }
  0x16   : > { %v76_v17 = vadd.f32 %v75_v16, %v74_v15  ;;  %v363_v15 = vld [vmem:[%s183_s16 + $0x8] sm:$0xff]  ;;  %s207_s16 = smov %s183_s16 }
  0x17   : > { %s253_s18 = scalar_lea.vmem %s207_s16, %s393_s13  ;;  %s52_s13 = sadd.s32 1, %s393_s13  }
  0x18   : > { %v77_v18 = vrot.slane %v76_v17, 1  ;;  %p49_p0 = scmp.ge.s32.totalorder %s52_s13, 12  }
  0x1a   : > { %v433_v19 = vadd.f32 %v77_v18, %v76_v17 }
  0x1c   : > { %377 = vrsqrt.f32 %v433_v19  ;;  %vm81_vm4 = vcmp.eq.f32.partialorder %v433_v19, inf  ;;  %v84_v23 = vand.u32 2147483648, %v433_v19  ;;  %vm83_vm5 = vcmp.eq.f32.partialorder %v433_v19, 0.0 }
  0x26   : > { %v378_v22 = vpop.eup %377 }
  0x27   : > { %v80_v24 = vmul.f32 %v378_v22, %v433_v19 }
  0x29   : > { %v82_v25 = vsel %vm81_vm4, %v433_v19, %v80_v24 }
  0x2a   : > { %v85_v27 = vsel %vm83_vm5, %v84_v23, %v82_v25 }
  0x2b   : > { %v95_v28 = vand.u32 2147483647, %v85_v27  ;;  %v232_v27 = vadd.s32 8, %v211_v5 }
  0x2d   : > { %v96_v29 = vmax.f32 %v94_v26, %v95_v28  ;;  %vm249_vm1 = vcmp.ge.s32.totalorder %v232_v27, %v427_v6 }
  0x2e   : > { %vm250_vm4 = vmand %vm457_vm14, %vm249_vm1 }
  0x2f   : > { %379 = vrcp.f32 %v96_v29  ;;  %vm108_vm8 = vcmp.eq.f32.partialorder %v96_v29, 0.0 }
  0x39   : > { %v380_v30 = vpop.eup %379 }
  0x3a   : > { %v98_v31 = vmul.f32 %v380_v30, %v93_v21  ;;  %v101_v32 = vmul.f32 0.0, %v380_v30  ;;  %v105_v33 = vmul.f32 %v380_v30, %v95_v28 }
  0x3c   : > { %v99_v34 = vmul.f32 %v98_v31, %v98_v31  ;;  %v102_v35 = vmul.f32 %v101_v32, %v101_v32  ;;  %v106_v36 = vmul.f32 %v105_v33, %v105_v33  ;;  %v365_v33 = vld [vmem:[%s207_s16 + $0x8] sm:$0xff] }
  0x3e   : > { %v103_v37 = vadd.f32 %v102_v35, %v99_v34 }
  0x40   : > { %v107_v38 = vadd.f32 %v106_v36, %v103_v37 }
  0x42   : > { %381 = vrsqrt.f32 %v107_v38  ;;  %vm111_vm6 = vcmp.eq.f32.partialorder %v107_v38, inf  ;;  %v114_v40 = vand.u32 2147483648, %v107_v38  ;;  %vm113_vm7 = vcmp.eq.f32.partialorder %v107_v38, 0.0 }
  0x4c   : > { %v382_v39 = vpop.eup %381 }
  0x4d   : > { %v110_v41 = vmul.f32 %v382_v39, %v107_v38 }
  0x4f   : > { %v112_v42 = vsel %vm111_vm6, %v107_v38, %v110_v41 }
  0x50   : > { %v115_v43 = vsel %vm113_vm7, %v114_v40, %v112_v42 }
  0x51   : > { %v116_v44 = vmul.f32 %v115_v43, %v96_v29  ;;  %v218_v29 = vld [vmem:[%s207_s16] sm:$0xff] }
  0x53   : > { %v117_v45 = vsel %vm108_vm8, 0.0, %v116_v44 }
  0x54   : > { %v119_v46 = vxor.u32 2147483648, %v117_v45 }
  0x56   : > { %v120_v47 = vsel %vm118_vm9, %v117_v45, %v119_v46 }
  0x57   : > { %v447_v48 = vsel %vm83_vm5, %v92_v20, %v120_v47  ;;  %383 = vrcp.f32 %v120_v47  ;;  %v121_v51 = vsub.f32 %v120_v47, %v92_v20 }
  0x58   : > { %v126_v49 = vsub.f32 %v92_v20, %v447_v48 }
  0x5a   : > { %385 = vrcp.f32 %v126_v49 }
  0x61   : > { %v384_v55 = vpop.eup %383 }
  0x62   : > { %v123_v58 = vmul.f32 %v384_v55, %v121_v51 }
  0x64   : > { %v386_v59 = vpop.eup %385  ;;  %v125_v61 = vsel %vm83_vm5, 0.0, %v123_v58 }
  0x65   : > { %v137_v62 = vmul.f32 %v386_v59, %v135_v56  ;;  %v156_v63 = vmul.f32 %v386_v59, %v154_v57  ;;  %v173_v0 = vsel %vm457_vm14, %v125_v61, 0.0 }
  0x66   : > { %174 = vadd.xlane.f32.xlu1 %v173_v0 }
  0x67   : > { %v138_v1 = vsel %vm83_vm5, 0.0, %v137_v62  ;;  %v157_v2 = vsel %vm83_vm5, 0.0, %v156_v63 }
  0x68   : > { %v143_v3 = vsel %vm457_vm14, %v138_v1, 0.0  ;;  %v162_v4 = vsel %vm457_vm14, %v157_v2, 0.0 }
  0x69   : > { %144 = vadd.xlane.f32.xlu0 %v143_v3 }
  0x6d   : > { %163 = vadd.xlane.f32.xlu0 %v162_v4 }
  0xf3   : > { %v175_v8 = vpop.xlane.xlu1 %174 }
  0xf4   : > { %v181_v9 = vsel %vm457_vm14, %v175_v8, %v180_v7 }
  0xf5   : > { %182 = vst [vmem:[#allocation2] sm:$0x1] %v181_v9 }
  0xf6   : > { %v145_v10 = vpop.xlane.xlu0 %144 }
  0xf7   : > { %146 = vst [vmem:[#allocation4] sm:$0xff] %v145_v10 }
  0xfa   : > { %v164_v11 = vpop.xlane.xlu0 %163 }
  0xfb   : > { %166 = vst [vmem:[#allocation4 + $0x8] sm:$0xff] %v164_v11 }
  0xfc   : > { %168 = vst [vmem:[%s167_s15] sm:$0x1] %v396_v12  ;;  %v264_v42 = vld [vmem:[#allocation2] sm:$0x1] (%p49_p0) }
  0xfd   :  { %266 = vst [vmem:[#allocation3] sm:$0x1] (%p49_p0), %v264_v42 }
 0x103   : > { %v189_v16 = vld [vmem:[%s184_s17] sm:$0xff]  ;;  %v362_v17 = vld [vmem:[%s184_s17 + $0x8] sm:$0xff]  ;;  %s208_s17 = smov %s184_s17 }
 0x104   : > { %v191_v18 = vmul.f32 %v190_v14, %v189_v16  ;;  %v197_v19 = vmul.f32 %v363_v15, %v362_v17  ;;  %v216_v31 = vld [vmem:[%s208_s17] sm:$0xff]  ;;  %v364_v32 = vld [vmem:[%s208_s17 + $0x8] sm:$0xff]  ;;  %v320_v45 = vld [vmem:[#allocation3] sm:$0x1] (%p49_p0) }
 0x105   :  { %321 = vst [vmem:[%s504_s2] sm:$0x1] (%p49_p0), %v320_v45 }
 0x106   : > { %v199_v20 = vsel %vm198_vm15, %v197_v19, 0.0 }
 0x107   : > { %v200_v21 = vadd.f32 %v199_v20, %v191_v18 }
 0x109   : > { %v201_v22 = vrot.slane %v200_v21, 4 }
 0x10b   : > { %v202_v23 = vadd.f32 %v201_v22, %v200_v21 }
 0x10d   : > { %v203_v24 = vrot.slane %v202_v23, 2 }
 0x10f   : > { %v204_v25 = vadd.f32 %v203_v24, %v202_v23 }
 0x111   : > { %v205_v26 = vrot.slane %v204_v25, 1 }
 0x113   : > { %v206_v28 = vadd.f32 %v205_v26, %v204_v25 }
 0x115   : > { %v212_v30 = vmul.f32 %v206_v28, %v175_v8 }
 0x117   : > { %v217_v34 = vmul.f32 %v216_v31, %v212_v30  ;;  %v237_v35 = vmul.f32 %v364_v32, %v212_v30 }
 0x119   : > { %v221_v36 = vsub.f32 %v218_v29, %v217_v34  ;;  %v242_v5 = vsub.f32 %v365_v33, %v237_v35 }
 0x11b   : > { %v222_v37 = vsel %vm220_vm2, %v221_v36, %v218_v29  ;;  %v243_v38 = vsel %vm220_vm2, %v242_v5, %v365_v33 }
 0x11c   : > { %v230_v39 = vsel %vm229_vm3, %v216_v31, %v222_v37  ;;  %v251_v40 = vsel %vm250_vm4, %v364_v32, %v243_v38 }
 0x11d   : > { %231 = vst [vmem:[%s207_s16] sm:$0xff] %v230_v39  ;;  %366 = vst [vmem:[%s207_s16 + $0x8] sm:$0xff] %v251_v40 }
 0x120   :  { %51 = sbr.rel (!%p49_p0) target bundleno = 3 (0x3), region = 148 }
 0x124   : > { %v254_v41 = vld [vmem:[%s253_s18] ss:$0 sm:$0xff] }
 0x125   : > { %v259_v6 = vsel %vm457_vm14, %v447_v48, %v254_v41 }
 0x126   : > { %260 = vst [vmem:[%s253_s18] sm:$0x1] %v259_v6 }
 0x12d   :  { %v296_v43 = vld [vmem:[#allocation1] sm:$0xff]  ;;  %v298_v44 = vld [vmem:[#allocation1 + $0x8] sm:$0xff] }
 0x12e   :  { %297 = vst [vmem:[%s503_s1] sm:$0xff] %v296_v43  ;;  %299 = vst [vmem:[%s503_s1 + $0x8] sm:$0xff] %v298_v44 }

// kernel: _forward_impl.1
= control target key start
LH: loop header
LB: loop body
LE: loop exit
PB: predicated region body
PF: predicated region fallthrough
CT: control target
= control target key end

     0   :  { %v366_v1 = vmov 0   ;;  %vm194_vm0 = vcmask 1043456   ;;  %vm169_vm1 = vcmask 64512   ;;  %s450_s1 = inlined_call_operand.vmem [shape: bf16[128,256], index: 1, kind: input, shape index: {}]   ;;  %s451_s0 = inlined_call_operand.vmem [shape: f32[8,128], index: 0, kind: input, shape index: {}]   ;;  %s452_s2 = inlined_call_operand.vmem [shape: f32[24,128], index: 2, kind: output, shape index: {}]  }
   0x1   :  { %v342_v0 = vld [vmem:[%s450_s1 + $0x4] ss:$8 sps:$4 sm:$0xff]   ;;  %142 = vmatprep.mubr.bf16.mxu0 %v366_v1  ;;  %v344_v2 = vld [vmem:[%s450_s1] ss:$8 sps:$4 sm:$0xff]   ;;  %v345_v3 = vld [vmem:[%s450_s1 + $0x14] ss:$8 sps:$4 sm:$0xff]  }
   0x2   :  { %110 = vmatprep.subr.bf16.mxu0 %v342_v0  ;;  %v347_v4 = vld [vmem:[%s450_s1 + $0x10] ss:$8 sps:$4 sm:$0xff]   ;;  %v348_v5 = vld [vmem:[%s450_s1 + $0x24] ss:$8 sps:$4 sm:$0xff]   ;;  %v350_v6 = vld [vmem:[%s450_s1 + $0x20] ss:$8 sps:$4 sm:$0xff]  }
   0x3   :  { %111 = vmatpush1.bf16.msra.mxu0 %v344_v2  ;;  %v351_v7 = vld [vmem:[%s450_s1 + $0x34] ss:$8 sps:$4 sm:$0xff]   ;;  %v353_v8 = vld [vmem:[%s450_s1 + $0x30] ss:$8 sps:$4 sm:$0xff]   ;;  %v354_v9 = vld [vmem:[%s450_s1 + $0x44] ss:$8 sps:$4 sm:$0xff]  }
   0x4   :  { %112 = vmatprep.subr.bf16.mxu0 %v345_v3  ;;  %v356_v10 = vld [vmem:[%s450_s1 + $0x40] ss:$8 sps:$4 sm:$0xff]   ;;  %v357_v11 = vld [vmem:[%s450_s1 + $0x54] ss:$8 sps:$4 sm:$0xff]   ;;  %v359_v12 = vld [vmem:[%s450_s1 + $0x50] ss:$8 sps:$4 sm:$0xff]  }
   0x5   :  { %v360_v13 = vld [vmem:[%s450_s1 + $0x64] ss:$8 sps:$4 sm:$0xff]   ;;  %v362_v14 = vld [vmem:[%s450_s1 + $0x60] ss:$8 sps:$4 sm:$0xff]   ;;  %v363_v15 = vld [vmem:[%s450_s1 + $0x74] ss:$8 sps:$4 sm:$0xff]  }
   0x6   :  { %v365_v16 = vld [vmem:[%s450_s1 + $0x70] ss:$8 sps:$4 sm:$0xff]   ;;  %v12_v17 = vld [vmem:[%s451_s0] sm:$0xff] }
   0x7   :  { %113 = vmatpush1.bf16.msra.mxu0 %v347_v4  ;;  %v13_v18 = vpack.c.bf16 %v12_v17, %v12_v17 }
   0x8   :  { %114 = vmatprep.subr.bf16.mxu0 %v348_v5 }
   0xb   :  { %115 = vmatpush1.bf16.msra.mxu0 %v350_v6 }
   0xc   :  { %116 = vmatprep.subr.bf16.mxu0 %v351_v7 }
   0xf   :  { %117 = vmatpush1.bf16.msra.mxu0 %v353_v8 }
  0x10   :  { %118 = vmatprep.subr.bf16.mxu0 %v354_v9 }
  0x13   :  { %119 = vmatpush1.bf16.msra.mxu0 %v356_v10 }
  0x14   :  { %120 = vmatprep.subr.bf16.mxu0 %v357_v11 }
  0x17   :  { %121 = vmatpush1.bf16.msra.mxu0 %v359_v12 }
  0x18   :  { %122 = vmatprep.subr.bf16.mxu0 %v360_v13 }
  0x1b   :  { %123 = vmatpush1.bf16.msra.mxu0 %v362_v14 }
  0x1c   :  { %124 = vmatprep.subr.bf16.mxu0 %v363_v15 }
  0x1f   :  { %125 = vmatpush1.bf16.msra.mxu0 %v365_v16 }
  0x22   :  { %143 = vmatmul.mubr.bf16.vlgmr.msra.gmra.mrb[0].mxu0 %v13_v18 }
  0xf5   :  { %v144_v19 = vpop.f32.mrb[0].mxu0 }
  0xf6   :  { %v151_v20 = vpack.c.bf16 %v144_v19, %v144_v19  ;;  %v146_v21 = vpop.f32.mrb[1].mxu0 }
  0xf7   :  { %v148_v22 = vpop.f32.mrb[2].mxu0  ;;  %v152_v23 = vpack.c.bf16 %v146_v21, %v146_v21 }
  0xf8   :  { %v149_v24 = vpop.f32.mrb[3].mxu0  ;;  %340 = vmatprep.subr.msk.bf16.mxu1 %vm194_vm0, %v151_v20  ;;  %v196_v25 = vsel %vm194_vm0, %v151_v20, 0 }
  0xf9   :  { %323 = vmatpush3.bf16.msra.mxu1 %v196_v25  ;;  %153 = vxpose.xlu0.c.b16.start.end [1/1] (short) %v152_v23, 128 }
 0x15f   :  { %v161_v26 = vpop.trf.xlu0 }
 0x160   :  { %324 = vmatprep.mubr.msk.bf16.mxu1 %vm169_vm1, %v161_v26 }
 0x163   :  { %v162_v27 = vpop.trf.xlu0 }
 0x164   :  { %325 = vmatmul.mubr.msk.bf16.vlgmr.msra.gmra.mrb[0].mxu1 %vm169_vm1, %v162_v27 }
 0x167   :  { %v163_v28 = vpop.trf.xlu0 }
 0x168   :  { %328 = vmatprep.mubr.msk.bf16.mxu1 %vm169_vm1, %v163_v28 }
 0x16b   :  { %v164_v29 = vpop.trf.xlu0 }
 0x16c   :  { %329 = vmatmul.mubr.msk.bf16.gmra.mrb[4].mxu1 %vm169_vm1, %v164_v29 }
 0x16f   :  { %v165_v30 = vpop.trf.xlu0 }
 0x170   :  { %332 = vmatprep.mubr.msk.bf16.mxu1 %vm169_vm1, %v165_v30 }
 0x173   :  { %v166_v31 = vpop.trf.xlu0 }
 0x174   :  { %333 = vmatmul.mubr.msk.bf16.gmra.mrb[8].mxu1 %vm169_vm1, %v166_v31 }
 0x177   :  { %v167_v32 = vpop.trf.xlu0 }
 0x178   :  { %336 = vmatprep.mubr.msk.bf16.mxu1 %vm169_vm1, %v167_v32 }
 0x17b   :  { %v168_v33 = vpop.trf.xlu0 }
 0x17c   :  { %337 = vmatmul.mubr.msk.bf16.gmra.mrb[12].mxu1 %vm169_vm1, %v168_v33 }
 0x237   :  { %v326_v34 = vpop.f32.mrb[0].mxu1 }
 0x238   :  { %284 = vst [vmem:[%s452_s2 + $0x10] sm:$0xff] %v326_v34  ;;  %v232_v35 = vpop.f32.mrb[1].mxu1 }
 0x239   :  { %282 = vst [vmem:[%s452_s2] sm:$0xff] %v232_v35  ;;  %v327_v36 = vpop.f32.mrb[2].mxu1 }
 0x23a   :  { %v235_v37 = vpop.f32.mrb[3].mxu1 }
 0x23b   :  { %283 = vst [vmem:[%s452_s2 + $0x8] sm:$0xff] %v235_v37 }
 0x23f   :  { %v330_v38 = vpop.f32.mrb[4].mxu1 }
 0x240   :  { %v247_v39 = vpop.f32.mrb[5].mxu1 }
 0x241   :  { %v331_v40 = vpop.f32.mrb[6].mxu1 }
 0x242   :  { %v249_v41 = vpop.f32.mrb[7].mxu1 }
 0x247   :  { %v334_v42 = vpop.f32.mrb[8].mxu1 }
 0x248   :  { %v259_v43 = vpop.f32.mrb[9].mxu1 }
 0x249   :  { %v335_v44 = vpop.f32.mrb[10].mxu1 }
 0x24a   :  { %v261_v45 = vpop.f32.mrb[11].mxu1 }
 0x24f   :  { %v338_v46 = vpop.f32.mrb[12].mxu1 }
 0x250   :  { %v271_v47 = vpop.f32.mrb[13].mxu1 }
 0x251   :  { %v339_v48 = vpop.f32.mrb[14].mxu1 }
 0x252   :  { %v273_v49 = vpop.f32.mrb[15].mxu1 }

</bundles_post_ra>
